<compile_context>
chip_gen: v5e
topology: v5e:2x2
jax: 0.10.0
libtpu: 0.0.40
codegen_flags: <defaults>
</compile_context>

<pallas_src>
import jax
import jax.numpy as jnp
import numpy as np
from jax.experimental import pallas as pl
from jax.experimental.pallas import tpu as pltpu


def embednet_kernel(x_ref, w1_ref, b1_ref, w2_ref, b2_ref, w3_ref, b3_ref, o_ref):
    # fc + ReLU           (bf16 MXU inputs, f32 accumulation, f32 elementwise)
    h = jnp.dot(x_ref[...], w1_ref[...], preferred_element_type=jnp.float32)
    h = jnp.maximum(h + b1_ref[...], 0.0)
    # classifier block: Linear with BatchNorm folded in -> ReLU -> Dropout(identity)
    h = jnp.dot(h.astype(jnp.bfloat16), w2_ref[...],
                preferred_element_type=jnp.float32)
    h = jnp.maximum(h + b2_ref[...], 0.0)
    # fc2
    out = jnp.dot(h.astype(jnp.bfloat16), w3_ref[...],
                  preferred_element_type=jnp.float32)
    o_ref[...] = (out + b3_ref[...]).astype(o_ref.dtype)


def embednet_forward(x, folded_params, *, tile_b=128):
    """x: (B, fc_in) f32.  folded_params: (w1, b1, w2', b2', w3, b3) f32."""
    B, F = x.shape
    w1, b1, w2, b2, w3, b3 = folded_params
    E = w3.shape[1]

    # --- batch tiling: multiple of 8 sublanes, prefer >= 2 grid steps (megacore) ---
    tb = min(tile_b, max(8, -(-B // 8) * 8))
    tb = max(8, (tb // 8) * 8)
    if pl.cdiv(B, tb) < 2 and B > 8:
        tb = max(8, 8 * ((B + 15) // 16))       # split batch into ~2 tiles
    n_tiles = pl.cdiv(B, tb)
    B_pad = n_tiles * tb
    if B_pad != B:                              # don't silently drop a partial tile
        x = jnp.pad(x, ((0, B_pad - B), (0, 0)))

    # --- bf16 at the MXU boundary; biases stay f32 ---
    xb = x.astype(jnp.bfloat16)
    w1b = w1.astype(jnp.bfloat16)
    w2b = w2.astype(jnp.bfloat16)
    w3b = w3.astype(jnp.bfloat16)

    def row_spec(d):
        # one batch tile per grid step, full feature width (lane-dense output)
        return pl.BlockSpec((tb, d), lambda i: (i, 0))

    def const_spec(a):
        # replicated parameter: constant block index -> single-buffered
        return pl.BlockSpec(a.shape, lambda i: (0,) * a.ndim,
                            pipeline_mode=pl.Buffered(1))

    out = pl.pallas_call(
        embednet_kernel,
        out_shape=jax.ShapeDtypeStruct((B_pad, E), jnp.float32),
        grid_spec=pltpu.PrefetchScalarGridSpec(
            num_scalar_prefetch=0,
            grid=(n_tiles,),
            in_specs=[
                row_spec(F),
                const_spec(w1b), const_spec(b1),
                const_spec(w2b), const_spec(b2),
                const_spec(w3b), const_spec(b3),
            ],
            out_specs=row_spec(E),
        ),
        compiler_params=pltpu.CompilerParams(
            dimension_semantics=("parallel",),
            vmem_limit_bytes=48 * 1024 * 1024,   # above v5e's 16 MiB default, below v7x's 64 MiB physical
        ),
    )(xb, w1b, b1, w2b, b2, w3b, b3)

    return out[:B]


# ----------------------------- parameters ------------------------------------

def init_params(key, fc_in_dim, fc_hid_dim, embed_dim):
    """Raw (PyTorch-equivalent) parameters; weights stored transposed (in, out)."""
    k = jax.random.split(key, 10)
    hid0, hid1 = fc_hid_dim

    def kaiming_uniform(kk, fan_in, shape):
        bound = 1.0 / np.sqrt(fan_in)
        return jax.random.uniform(kk, shape, jnp.float32, -bound, bound)

    def xavier_uniform(kk, fan_in, fan_out):
        bound = np.sqrt(6.0 / (fan_in + fan_out))
        return jax.random.uniform(kk, (fan_in, fan_out), jnp.float32, -bound, bound)

    # fc: Linear(fc_in_dim, hid0), PyTorch default init
    w1 = kaiming_uniform(k[0], fc_in_dim, (fc_in_dim, hid0))
    b1 = kaiming_uniform(k[1], fc_in_dim, (1, hid0))
    # classifier[0][0]: Linear(hid0, hid1), xavier_uniform weight
    w2 = xavier_uniform(k[2], hid0, hid1)
    b2 = kaiming_uniform(k[3], hid0, (1, hid1))
    # BatchNorm1d(hid1): deterministic non-trivial eval-mode stats/affine
    gamma = 1.0 + 0.1 * jax.random.normal(k[4], (1, hid1), jnp.float32)
    beta = 0.1 * jax.random.normal(k[5], (1, hid1), jnp.float32)
    running_mean = 0.05 * jax.random.normal(k[6], (1, hid1), jnp.float32)
    running_var = jnp.abs(jax.random.normal(k[7], (1, hid1), jnp.float32)) + 0.5
    # fc2: Linear(hid1, embed_dim)
    w3 = kaiming_uniform(k[8], hid1, (hid1, embed_dim))
    b3 = kaiming_uniform(k[9], hid1, (1, embed_dim))
    return (w1, b1, w2, b2, gamma, beta, running_mean, running_var, w3, b3)


def fold_bn_params(raw, eps=1e-5):
    """Fold eval-mode BatchNorm (and its bias path) into the second Linear."""
    w1, b1, w2, b2, gamma, beta, rm, rv, w3, b3 = raw
    scale = gamma / jnp.sqrt(rv + eps)            # (1, hid1)
    w2f = w2 * scale                              # column scale
    b2f = b2 * scale + (beta - rm * scale)
    return (w1, b1, w2f, b2f, w3, b3)


def reference_forward(x, raw, eps=1e-5):
    """Pure-JAX f32 reference of the PyTorch module in eval mode."""
    w1, b1, w2, b2, gamma, beta, rm, rv, w3, b3 = raw
    h = jnp.maximum(x @ w1 + b1, 0.0)
    h = h @ w2 + b2
    h = (h - rm) / jnp.sqrt(rv + eps) * gamma + beta
    h = jnp.maximum(h, 0.0)                       # Dropout == identity (eval)
    return h @ w3 + b3


if __name__ == "__main__":
    # Small, module-consistent shapes; batch large enough for a 128-row tile and
    # >= 2 grid steps, feature dims lane-dense multiples of 128.
    B, FC_IN, HID, EMBED = 256, 256, [256, 256], 256

    key = jax.random.PRNGKey(0)
    kx, kp = jax.random.split(key)
    x = jax.random.normal(kx, (B, FC_IN), jnp.float32)

    raw = init_params(kp, FC_IN, HID, EMBED)
    folded = fold_bn_params(raw)

    out = embednet_forward(x, folded, tile_b=128)
    out = jax.block_until_ready(out)

    ref = reference_forward(x, raw)
    # bf16 matmul inputs with f32 accumulation: allow ~1e-2-scale deviation.
    np.testing.assert_allclose(np.asarray(out), np.asarray(ref),
                               rtol=5e-2, atol=5e-2)
    print("KERNEL_OK")
</pallas_src>

<mosaic_0001>
module attributes {stable_mosaic.version = 11 : i64} {
  func.func @embednet_kernel(%arg0: i32, %arg1: memref<128x256xbf16, #tpu.memory_space<vmem>>, %arg2: memref<256x256xbf16, #tpu.memory_space<vmem>>, %arg3: memref<1x256xf32, #tpu.memory_space<vmem>>, %arg4: memref<256x256xbf16, #tpu.memory_space<vmem>>, %arg5: memref<1x256xf32, #tpu.memory_space<vmem>>, %arg6: memref<256x256xbf16, #tpu.memory_space<vmem>>, %arg7: memref<1x256xf32, #tpu.memory_space<vmem>>, %arg8: memref<128x256xf32, #tpu.memory_space<vmem>>) attributes {dimension_semantics = [#tpu.dimension_semantics<parallel>], iteration_bounds = array<i64: 2>, scalar_prefetch = 0 : i64, scratch_operands = 0 : i64, tpu.core_type = #tpu.core_type<tc>, window_params = [{transform_indices = @transform_0, window_bounds = array<i64: 128, 256>}, {pipeline_mode = #tpu.pipeline_mode<synchronous>, transform_indices = @transform_1, window_bounds = array<i64: 256, 256>}, {pipeline_mode = #tpu.pipeline_mode<synchronous>, transform_indices = @transform_2, window_bounds = array<i64: 1, 256>}, {pipeline_mode = #tpu.pipeline_mode<synchronous>, transform_indices = @transform_3, window_bounds = array<i64: 256, 256>}, {pipeline_mode = #tpu.pipeline_mode<synchronous>, transform_indices = @transform_4, window_bounds = array<i64: 1, 256>}, {pipeline_mode = #tpu.pipeline_mode<synchronous>, transform_indices = @transform_5, window_bounds = array<i64: 256, 256>}, {pipeline_mode = #tpu.pipeline_mode<synchronous>, transform_indices = @transform_6, window_bounds = array<i64: 1, 256>}, {transform_indices = @transform_7, window_bounds = array<i64: 128, 256>}]} {
    %c0 = arith.constant 0 : index
    %c0_0 = arith.constant 0 : index
    %0 = vector.load %arg1[%c0, %c0_0] : memref<128x256xbf16, #tpu.memory_space<vmem>>, vector<128x256xbf16>
    %c0_1 = arith.constant 0 : index
    %c0_2 = arith.constant 0 : index
    %1 = vector.load %arg2[%c0_1, %c0_2] : memref<256x256xbf16, #tpu.memory_space<vmem>>, vector<256x256xbf16>
    %cst = arith.constant dense<0.000000e+00> : vector<128x256xf32>
    %2 = tpu.matmul %0, %1, %cst {dimension_numbers = #tpu.dot_dimension_numbers<[1], [0], [0], [1], [0, 0, 1, 1], [], []>} : vector<128x256xbf16>, vector<256x256xbf16>, vector<128x256xf32> -> vector<128x256xf32>
    %c0_3 = arith.constant 0 : index
    %c0_4 = arith.constant 0 : index
    %3 = vector.load %arg3[%c0_3, %c0_4] : memref<1x256xf32, #tpu.memory_space<vmem>>, vector<1x256xf32>
    %4 = vector.broadcast %3 : vector<1x256xf32> to vector<128x256xf32>
    %5 = arith.addf %2, %4 : vector<128x256xf32>
    %cst_5 = arith.constant 0.000000e+00 : f32
    %6 = vector.broadcast %cst_5 : f32 to vector<128x256xf32>
    %7 = arith.maximumf %5, %6 : vector<128x256xf32>
    %8 = arith.truncf %7 : vector<128x256xf32> to vector<128x256xbf16>
    %c0_6 = arith.constant 0 : index
    %c0_7 = arith.constant 0 : index
    %9 = vector.load %arg4[%c0_6, %c0_7] : memref<256x256xbf16, #tpu.memory_space<vmem>>, vector<256x256xbf16>
    %cst_8 = arith.constant dense<0.000000e+00> : vector<128x256xf32>
    %10 = tpu.matmul %8, %9, %cst_8 {dimension_numbers = #tpu.dot_dimension_numbers<[1], [0], [0], [1], [0, 0, 1, 1], [], []>} : vector<128x256xbf16>, vector<256x256xbf16>, vector<128x256xf32> -> vector<128x256xf32>
    %c0_9 = arith.constant 0 : index
    %c0_10 = arith.constant 0 : index
    %11 = vector.load %arg5[%c0_9, %c0_10] : memref<1x256xf32, #tpu.memory_space<vmem>>, vector<1x256xf32>
    %12 = vector.broadcast %11 : vector<1x256xf32> to vector<128x256xf32>
    %13 = arith.addf %10, %12 : vector<128x256xf32>
    %cst_11 = arith.constant 0.000000e+00 : f32
    %14 = vector.broadcast %cst_11 : f32 to vector<128x256xf32>
    %15 = arith.maximumf %13, %14 : vector<128x256xf32>
    %16 = arith.truncf %15 : vector<128x256xf32> to vector<128x256xbf16>
    %c0_12 = arith.constant 0 : index
    %c0_13 = arith.constant 0 : index
    %17 = vector.load %arg6[%c0_12, %c0_13] : memref<256x256xbf16, #tpu.memory_space<vmem>>, vector<256x256xbf16>
    %cst_14 = arith.constant dense<0.000000e+00> : vector<128x256xf32>
    %18 = tpu.matmul %16, %17, %cst_14 {dimension_numbers = #tpu.dot_dimension_numbers<[1], [0], [0], [1], [0, 0, 1, 1], [], []>} : vector<128x256xbf16>, vector<256x256xbf16>, vector<128x256xf32> -> vector<128x256xf32>
    %c0_15 = arith.constant 0 : index
    %c0_16 = arith.constant 0 : index
    %19 = vector.load %arg7[%c0_15, %c0_16] : memref<1x256xf32, #tpu.memory_space<vmem>>, vector<1x256xf32>
    %20 = vector.broadcast %19 : vector<1x256xf32> to vector<128x256xf32>
    %21 = arith.addf %18, %20 : vector<128x256xf32>
    %c0_17 = arith.constant 0 : index
    %c0_18 = arith.constant 0 : index
    %22 = vector.load %arg8[%c0_17, %c0_18] : memref<128x256xf32, #tpu.memory_space<vmem>>, vector<128x256xf32>
    tpu.vector_store %arg8[%c0_17, %c0_18], %21 {strides = array<i32>} : memref<128x256xf32, #tpu.memory_space<vmem>>, vector<128x256xf32>,
    return
  }
  func.func @transform_0(%arg0: i32) -> (i32, i32) {
    %c0_i32 = arith.constant 0 : i32
    %c0_i32_0 = arith.constant 0 : i32
    return %arg0, %c0_i32 : i32, i32
  }
  func.func @transform_1(%arg0: i32) -> (i32, i32) {
    %c0_i32 = arith.constant 0 : i32
    %c0_i32_0 = arith.constant 0 : i32
    %c0_i32_1 = arith.constant 0 : i32
    return %c0_i32, %c0_i32_0 : i32, i32
  }
  func.func @transform_2(%arg0: i32) -> (i32, i32) {
    %c0_i32 = arith.constant 0 : i32
    %c0_i32_0 = arith.constant 0 : i32
    %c0_i32_1 = arith.constant 0 : i32
    return %c0_i32, %c0_i32_0 : i32, i32
  }
  func.func @transform_3(%arg0: i32) -> (i32, i32) {
    %c0_i32 = arith.constant 0 : i32
    %c0_i32_0 = arith.constant 0 : i32
    %c0_i32_1 = arith.constant 0 : i32
    return %c0_i32, %c0_i32_0 : i32, i32
  }
  func.func @transform_4(%arg0: i32) -> (i32, i32) {
    %c0_i32 = arith.constant 0 : i32
    %c0_i32_0 = arith.constant 0 : i32
    %c0_i32_1 = arith.constant 0 : i32
    return %c0_i32, %c0_i32_0 : i32, i32
  }
  func.func @transform_5(%arg0: i32) -> (i32, i32) {
    %c0_i32 = arith.constant 0 : i32
    %c0_i32_0 = arith.constant 0 : i32
    %c0_i32_1 = arith.constant 0 : i32
    return %c0_i32, %c0_i32_0 : i32, i32
  }
  func.func @transform_6(%arg0: i32) -> (i32, i32) {
    %c0_i32 = arith.constant 0 : i32
    %c0_i32_0 = arith.constant 0 : i32
    %c0_i32_1 = arith.constant 0 : i32
    return %c0_i32, %c0_i32_0 : i32, i32
  }
  func.func @transform_7(%arg0: i32) -> (i32, i32) {
    %c0_i32 = arith.constant 0 : i32
    %c0_i32_0 = arith.constant 0 : i32
    return %arg0, %c0_i32 : i32, i32
  }
}

</mosaic_0001>

<bundles_post_ra>
// kernel: tpu_custom_call.1
= control target key start
LH: loop header
LB: loop body
LE: loop exit
PB: predicated region body
PF: predicated region fallthrough
CT: control target
= control target key end

     0   :  { %s3212_s0 = inlined_call_operand.hbm [shape: bf16[256,256], index: 0, kind: input, shape index: {}]   ;;  %s3213_s1 = inlined_call_operand.hbm [shape: bf16[256,256], index: 1, kind: input, shape index: {}]   ;;  %s3214_s2 = inlined_call_operand.hbm [shape: f32[1,256], index: 2, kind: input, shape index: {}]   ;;  %s3215_s3 = inlined_call_operand.hbm [shape: bf16[256,256], index: 3, kind: input, shape index: {}]   ;;  %s3216_s4 = inlined_call_operand.vmem [shape: f32[1,256], index: 4, kind: input, shape index: {}]   ;;  %s3217_s5 = inlined_call_operand.hbm [shape: bf16[256,256], index: 5, kind: input, shape index: {}]   ;;  %s3218_s6 = inlined_call_operand.vmem [shape: f32[1,256], index: 6, kind: input, shape index: {}]   ;;  %s3219_s7 = inlined_call_operand.hbm [shape: f32[256,256], index: 7, kind: output, shape index: {}]  }
   0x1   :  { %3222 = sst [smem:[#allocation16_spill]] %s3213_s1 }
   0x2   :  { %12 = vsyncpa [#allocation3], 0 }
   0x3   :  { %14 = vsyncpa [#allocation3 + $0x1], 0 }
   0x4   :  { %15 = vsyncpa [#allocation6], 0 }
   0x5   :  { %16 = vsyncpa [#allocation9], 0 }
   0x6   :  { %17 = vsyncpa [#allocation4], 0 }
   0x7   :  { %19 = vsyncpa [#allocation4 + $0x1], 0  ;;  %s2853_s24 = smov 0   ;;  %s2855_s25 = smov 0  }
   0x8   :  { %s2857_s26 = smov 0   ;;  %s2859_s27 = smov 0  }
   0x9 LB: > { %s2874_s28 = sadd.s32 4294967295, %s2803_s27   ;;  %s1900_s29 = sadd.s32 4294967294, %s2803_s27   ;;  %s2803_s27 = sphi %s2859_s27, %s3236_s27   ;;  %s2799_s26 = sphi %s2857_s26, %s3235_s26   ;;  %s2795_s25 = sphi %s2855_s25, %s3234_s25   ;;  %s2791_s24 = sphi %s2853_s24, %s3233_s24  }
   0xa   : > { %p45_p0 = scmp.ne.s32.totalorder %s2795_s25, %s2791_s24  ;;  %p46_p1 = scmp.eq.s32.totalorder %s2874_s28, 0 }
   0xb   : > { %p195_p2 = scmp.eq.s32.totalorder %s2874_s28, 1  ;;  %p201_p3 = scmp.eq.s32.totalorder %s1900_s29, 1 }
   0xc   : > { %p2883_p4 = por %p46_p1, %p45_p0  ;;  %p1901_p5 = scmp.ge.s32.totalorder %s2803_s27, 1 }
   0xd   : > { %p2888_p6 = por %p201_p3, %p45_p0  ;;  %p208_p7 = scmp.lt.s32.totalorder %s2803_s27, 3 }
   0xe   : > { %s3225_s1 = sld [smem:[#allocation16_spill]]  ;;  %s2805_s13 = smov [#allocation5]  }
   0xf   : > { %p2896_p8 = pnand %p1901_p5, %p208_p7  ;;  %s221_s14 = sshll.u32 %s2805_s13, 4  ;;  %s222_s14 = int_to_ptr.vmem [resolvable:$true] %s221_s14 }
  0x10   : > { %s245_s18 = sshll.u32 %s3215_s3, 4  ;;  %s3220_s19 = smov 128   ;;  %s246_s18 = int_to_ptr.hbm [resolvable:$true] %s245_s18 }
  0x11   : > { %p2508_p9 = pneg %p2896_p8  ;;  %s3221_s20 = smov 8  }
  0x12   : > { %s2808_s21 = smov [#allocation8]   ;;  %s234_s9 = sshll.u32 %s3214_s2, 4  ;;  %s235_s9 = int_to_ptr.hbm [resolvable:$true] %s234_s9 }
  0x13   : > { %p2904_p10 = pnand %p2508_p9, %p46_p1  ;;  %s247_s22 = sshll.u32 %s2808_s21, 4  ;;  %s248_s22 = int_to_ptr.vmem [resolvable:$true] %s247_s22 }
  0x14   : > { %s219_s11 = sshll.u32 %s3225_s1, 4  ;;  %s262_s13 = sshll.u32 %s3217_s5, 4  ;;  %s220_s11 = int_to_ptr.hbm [resolvable:$true] %s219_s11  ;;  %s263_s13 = int_to_ptr.hbm [resolvable:$true] %s262_s13 }
  0x15   : > { %2511 = dma.hbm_to_vmem [thread:$0]  (!%p2904_p10), %s220_s11, 4096, %s222_s14, [#allocation6], %s3220_s19, %s3220_s19, %s3221_s20  }
  0x16   : > { %2517 = dma.hbm_to_vmem [thread:$0]  (!%p2904_p10), %s246_s18, 4096, %s248_s22, [#allocation9], %s3220_s19, %s3220_s19, %s3221_s20  }
  0x17   : > { %s2809_s14 = smov [#allocation7]   ;;  %s2810_s17 = smov [#allocation10]  }
  0x18   : > { %s236_s16 = sshll.u32 %s2809_s14, 4  ;;  %s264_s21 = sshll.u32 %s2810_s17, 4  ;;  %s237_s16 = int_to_ptr.vmem [resolvable:$true] %s236_s16  ;;  %s265_s21 = int_to_ptr.vmem [resolvable:$true] %s264_s21 }
  0x19   : > { %2514 = dma.hbm_to_vmem [thread:$0]  (!%p2904_p10), %s235_s9, 32, %s237_s16, [#allocation6]  }
  0x1a   : > { %2520 = dma.hbm_to_vmem [thread:$0]  (!%p2904_p10), %s263_s13, 4096, %s265_s21, [#allocation9], %s3220_s19, %s3220_s19, %s3221_s20  }
  0x1b   : > { %s2936_s18 = sadd.s32 1, %s2803_s27   ;;  %s32_s22 = sadd.s32 1, %s2799_s26 }
  0x1c   : > { %s29_s23 = ssub.s32 %s2803_s27, %s2936_s18  ;;  %p39_p12 = scmp.ne.s32.totalorder %s2799_s26, %s2795_s25 }
  0x1d   : > { %p30_p13 = scmp.eq.s32.totalorder %s29_s23, 0  ;;  %p40_p0 = scmp.eq.s32.totalorder %s2803_s27, 0 }
  0x1e   : > { %p2946_p3 = por %p195_p2, %p39_p12  ;;  %p2533_p5 = scmp.lt.s32.totalorder %s2803_s27, 2 }
  0x1f   : > { %s2952_s9 = scalar_select %p30_p13, %s2799_s26, %s32_s22  }
  0x20   : > { %p41_p7 = por %p40_p0, %p39_p12  ;;  %s281_s15 = sand.u32 1, %s2799_s26  }
  0x21   : > { %s1907_s10 = sshll.u32 %s281_s15, 7  ;;  %s2373_s11 = sshll.u32 %s2803_s27, 7 }
  0x22   : > { %s291_s16 = scalar_lea.hbm %s3212_s0, %s2373_s11  ;;  %s285_s17 = scalar_lea.vmem [#allocation2], %s1907_s10 }
  0x23   : > { %s294_s21 = sshll.u32 %s285_s17, 4  ;;  %s292_s23 = sshll.u32 %s291_s16, 4  ;;  %s295_s21 = int_to_ptr.vmem [resolvable:$true] %s294_s21  ;;  %s293_s23 = int_to_ptr.hbm [resolvable:$true] %s292_s23 }
  0x24   : > { %p2959_p2 = pnand %p2533_p5, %p41_p7  ;;  %s282_s22 = scalar_lea.sflag [#allocation3], %s281_s15 }
  0x25   : > { %s2699_s20 = sshra.s32 %s293_s23, 4  ;;  %s2706_s13 = scalar_lea.hbm %s3212_s0, 256  ;;  %s2700_s20 = int_to_ptr.hbm [resolvable:$true] %s2699_s20 }
  0x26   : > { %s2701_s1 = scalar_lea.hbm %s2700_s20, 128  ;;  %p2703_p10 = pneg %p2959_p2 }
  0x27   : > { %p2702_p9 = scmp.ne.s32.totalorder %s2700_s20, %s2701_s1  ;;  %p2707_p0 = scmp.lt.s32.totalorder %s2700_s20, %s3212_s0 }
  0x28   : > { %p2708_p5 = scmp.lt.s32.totalorder %s2706_s13, %s2701_s1 }
  0x29   : > { %p2704_p12 = pnand %p2703_p10, %p2702_p9 }
  0x2a   : > { %p2709_p7 = por %p2708_p5, %p2707_p0 }
  0x2b   : > { %p2705_p13 = pneg %p2704_p12 }
  0x2d   : > { %p2710_p11 = pnand %p2709_p7, %p2705_p13 }
  0x2f   : > { %2713 = shalt.err (!%p2710_p11)
}
  0x30   : > { %s3230_s15 = smov 8   ;;  %s3231_s17 = smov 128  }
  0x31   : > { %2524 = dma.hbm_to_vmem [thread:$0]  (!%p2959_p2), %s293_s23, 2048, %s295_s21, %s282_s22, %s3231_s17, %s3231_s17, %s3230_s15  }
  0x32   : > { %306 = sbr.rel (%p2896_p8) target bundleno = 648 (0x288), region = 48  ;;  %s2979_s11 = sand.u32 (!%p2896_p8), 1, %s2795_s25  }
  0x33   : > { %s1912_s20 = sshll.u32 (!%p2896_p8), %s2979_s11, 7  ;;  %s309_s1 = scalar_lea.sflag (!%p2896_p8), [#allocation3], %s2979_s11 }
  0x34   : > { %s2983_s10 = scalar_lea.vmem (!%p2896_p8), [#allocation2], %s1912_s20 }
  0x37   : > { %2774 = dma.done.wait (%p2883_p4), %s309_s1, 2048  }
  0x38   : > { %2776 = vsyncadd (%p2883_p4), %s309_s1, 4294965248 }
  0x39   : > { %2778 = dma.done.wait (%p46_p1), [#allocation6], 4128  }
  0x3a   : > { %2780 = vsyncadd (%p46_p1), [#allocation6], 4294963168 }
  0x3b   : > { %2782 = dma.done.wait (%p46_p1), [#allocation9], 8192  }
  0x3c   : > { %2784 = vsyncadd (%p46_p1), [#allocation9], 4294959104  ;;  %v2040_v0 = vld [vmem:[#allocation5 + $0x70] sm:$0xf]  ;;  %v2405_v1 = vld [vmem:[#allocation5 + $0x74] sm:$0xf0] }
  0x3d   : > { %v2104_v2 = vld [vmem:[#allocation5 + $0xf0] sm:$0xf]  ;;  %v2041_v3 = vor.u32 %v2405_v1, %v2040_v0  ;;  %v2421_v4 = vld [vmem:[#allocation5 + $0xf4] sm:$0xf0]  ;;  %v2404_v5 = vld [vmem:[#allocation5 + $0x74] sm:$0xf] }
  0x3e   : > { %v2042_v6 = vld [vmem:[#allocation5 + $0x78] sm:$0xf0]  ;;  %v2105_v7 = vor.u32 %v2421_v4, %v2104_v2  ;;  %v2420_v9 = vld [vmem:[#allocation5 + $0xf4] sm:$0xf]  ;;  %v2032_v11 = vld [vmem:[#allocation5 + $0x60] sm:$0xf] }
  0x3f   : > { %v2045_v8 = vor.u32 %v2404_v5, %v2042_v6  ;;  %v2106_v10 = vld [vmem:[#allocation5 + $0xf8] sm:$0xf0]  ;;  %660 = vmatpush.bf16.msra.mxu0 %v2041_v3  ;;  %v2403_v13 = vld [vmem:[#allocation5 + $0x64] sm:$0xf0]  ;;  %v2096_v14 = vld [vmem:[#allocation5 + $0xe0] sm:$0xf] }
  0x40   : > { %v2109_v12 = vor.u32 %v2420_v9, %v2106_v10  ;;  %v2419_v15 = vld [vmem:[#allocation5 + $0xe4] sm:$0xf0]  ;;  %709 = vmatpush.bf16.msra.mxu1 %v2105_v7  ;;  %v2033_v16 = vor.u32 %v2403_v13, %v2032_v11  ;;  %v2402_v18 = vld [vmem:[#allocation5 + $0x64] sm:$0xf]  ;;  %v2034_v19 = vld [vmem:[#allocation5 + $0x68] sm:$0xf0] }
  0x41   : > { %758 = vmatpush.bf16.msra.mxu2 %v2045_v8  ;;  %v2097_v17 = vor.u32 %v2419_v15, %v2096_v14  ;;  %v2418_v20 = vld [vmem:[#allocation5 + $0xe4] sm:$0xf]  ;;  %v2037_v21 = vor.u32 %v2402_v18, %v2034_v19  ;;  %v2098_v22 = vld [vmem:[#allocation5 + $0xe8] sm:$0xf0]  ;;  %v2024_v23 = vld [vmem:[#allocation5 + $0x50] sm:$0xf] }
  0x42   : > { %807 = vmatpush.bf16.msra.mxu3 %v2109_v12  ;;  %v2401_v24 = vld [vmem:[#allocation5 + $0x54] sm:$0xf0]  ;;  %v2101_v25 = vor.u32 %v2418_v20, %v2098_v22  ;;  %v2088_v26 = vld [vmem:[#allocation5 + $0xd0] sm:$0xf]  ;;  %v2400_v28 = vld [vmem:[#allocation5 + $0x54] sm:$0xf] }
  0x43   : > { %v2417_v27 = vld [vmem:[#allocation5 + $0xd4] sm:$0xf0]  ;;  %661 = vmatpush.bf16.msra.mxu0 %v2033_v16  ;;  %v2025_v29 = vor.u32 %v2401_v24, %v2024_v23  ;;  %v2026_v30 = vld [vmem:[#allocation5 + $0x58] sm:$0xf0]  ;;  %v2416_v31 = vld [vmem:[#allocation5 + $0xd4] sm:$0xf] }
  0x44   : > { %v2090_v32 = vld [vmem:[#allocation5 + $0xd8] sm:$0xf0]  ;;  %710 = vmatpush.bf16.msra.mxu1 %v2097_v17  ;;  %v2089_v33 = vor.u32 %v2417_v27, %v2088_v26  ;;  %v2029_v34 = vor.u32 %v2400_v28, %v2026_v30  ;;  %v2016_v35 = vld [vmem:[#allocation5 + $0x40] sm:$0xf]  ;;  %v2399_v36 = vld [vmem:[#allocation5 + $0x44] sm:$0xf0] }
  0x45   : > { %759 = vmatpush.bf16.msra.mxu2 %v2037_v21  ;;  %v2080_v37 = vld [vmem:[#allocation5 + $0xc0] sm:$0xf]  ;;  %v2093_v38 = vor.u32 %v2416_v31, %v2090_v32  ;;  %v2415_v39 = vld [vmem:[#allocation5 + $0xc4] sm:$0xf0]  ;;  %v2398_v40 = vld [vmem:[#allocation5 + $0x44] sm:$0xf]  ;;  %v2017_v44 = vor.u32 %v2399_v36, %v2016_v35 }
  0x46   : > { %808 = vmatpush.bf16.msra.mxu3 %v2101_v25  ;;  %v2018_v41 = vld [vmem:[#allocation5 + $0x48] sm:$0xf0]  ;;  %v2414_v42 = vld [vmem:[#allocation5 + $0xc4] sm:$0xf]  ;;  %v2081_v45 = vor.u32 %v2415_v39, %v2080_v37  ;;  %v2008_v47 = vld [vmem:[#allocation5 + $0x30] sm:$0xf] }
  0x47   : > { %v2082_v43 = vld [vmem:[#allocation5 + $0xc8] sm:$0xf0]  ;;  %662 = vmatpush.bf16.msra.mxu0 %v2025_v29  ;;  %v2021_v46 = vor.u32 %v2398_v40, %v2018_v41  ;;  %v2397_v48 = vld [vmem:[#allocation5 + $0x34] sm:$0xf0]  ;;  %v2072_v49 = vld [vmem:[#allocation5 + $0xb0] sm:$0xf] }
  0x48   : > { %711 = vmatpush.bf16.msra.mxu1 %v2089_v33  ;;  %v2085_v50 = vor.u32 %v2414_v42, %v2082_v43  ;;  %v2413_v51 = vld [vmem:[#allocation5 + $0xb4] sm:$0xf0]  ;;  %v2396_v52 = vld [vmem:[#allocation5 + $0x34] sm:$0xf]  ;;  %v2010_v53 = vld [vmem:[#allocation5 + $0x38] sm:$0xf0]  ;;  %v2009_v56 = vor.u32 %v2397_v48, %v2008_v47 }
  0x49   : > { %760 = vmatpush.bf16.msra.mxu2 %v2029_v34  ;;  %v2412_v54 = vld [vmem:[#allocation5 + $0xb4] sm:$0xf]  ;;  %v2074_v55 = vld [vmem:[#allocation5 + $0xb8] sm:$0xf0]  ;;  %v2073_v57 = vor.u32 %v2413_v51, %v2072_v49  ;;  %v2013_v58 = vor.u32 %v2396_v52, %v2010_v53  ;;  %v2000_v59 = vld [vmem:[#allocation5 + $0x20] sm:$0xf] }
  0x4a   : > { %809 = vmatpush.bf16.msra.mxu3 %v2093_v38  ;;  %v2395_v60 = vld [vmem:[#allocation5 + $0x24] sm:$0xf0]  ;;  %v2064_v61 = vld [vmem:[#allocation5 + $0xa0] sm:$0xf]  ;;  %v2077_v62 = vor.u32 %v2412_v54, %v2074_v55  ;;  %v2394_v0 = vld [vmem:[#allocation5 + $0x24] sm:$0xf] }
  0x4b   : > { %663 = vmatpush.bf16.msra.mxu0 %v2017_v44  ;;  %v2411_v63 = vld [vmem:[#allocation5 + $0xa4] sm:$0xf0]  ;;  %v2002_v1 = vld [vmem:[#allocation5 + $0x28] sm:$0xf0]  ;;  %v2410_v2 = vld [vmem:[#allocation5 + $0xa4] sm:$0xf]  ;;  %v2001_v4 = vor.u32 %v2395_v60, %v2000_v59 }
  0x4c   : > { %712 = vmatpush.bf16.msra.mxu1 %v2081_v45  ;;  %v2066_v3 = vld [vmem:[#allocation5 + $0xa8] sm:$0xf0]  ;;  %v2065_v5 = vor.u32 %v2411_v63, %v2064_v61  ;;  %v2005_v6 = vor.u32 %v2394_v0, %v2002_v1  ;;  %v1992_v7 = vld [vmem:[#allocation5 + $0x10] sm:$0xf]  ;;  %v2393_v8 = vld [vmem:[#allocation5 + $0x14] sm:$0xf0] }
  0x4d   : > { %761 = vmatpush.bf16.msra.mxu2 %v2021_v46  ;;  %v2056_v9 = vld [vmem:[#allocation5 + $0x90] sm:$0xf]  ;;  %v2069_v10 = vor.u32 %v2410_v2, %v2066_v3  ;;  %v2409_v11 = vld [vmem:[#allocation5 + $0x94] sm:$0xf0]  ;;  %v2392_v12 = vld [vmem:[#allocation5 + $0x14] sm:$0xf]  ;;  %v1993_v16 = vor.u32 %v2393_v8, %v1992_v7 }
  0x4e   : > { %810 = vmatpush.bf16.msra.mxu3 %v2085_v50  ;;  %v1994_v13 = vld [vmem:[#allocation5 + $0x18] sm:$0xf0]  ;;  %v2408_v14 = vld [vmem:[#allocation5 + $0x94] sm:$0xf]  ;;  %v1984_v17 = vld [vmem:[#allocation5] sm:$0xf]  ;;  %v2057_v19 = vor.u32 %v2409_v11, %v2056_v9 }
  0x4f   : > { %664 = vmatpush.bf16.msra.mxu0 %v2009_v56  ;;  %v2058_v15 = vld [vmem:[#allocation5 + $0x98] sm:$0xf0]  ;;  %v2391_v18 = vld [vmem:[#allocation5 + $0x4] sm:$0xf0]  ;;  %v1997_v20 = vor.u32 %v2392_v12, %v1994_v13  ;;  %v2048_v21 = vld [vmem:[#allocation5 + $0x80] sm:$0xf] }
  0x50   : > { %713 = vmatpush.bf16.msra.mxu1 %v2073_v57  ;;  %v2407_v22 = vld [vmem:[#allocation5 + $0x84] sm:$0xf0]  ;;  %v2390_v23 = vld [vmem:[#allocation5 + $0x4] sm:$0xf]  ;;  %v2061_v24 = vor.u32 %v2408_v14, %v2058_v15  ;;  %v1986_v25 = vld [vmem:[#allocation5 + $0x8] sm:$0xf0]  ;;  %v1985_v31 = vor.u32 %v2391_v18, %v1984_v17 }
  0x51   : > { %762 = vmatpush.bf16.msra.mxu2 %v2013_v58  ;;  %v2406_v26 = vld [vmem:[#allocation5 + $0x84] sm:$0xf]  ;;  %v2050_v27 = vld [vmem:[#allocation5 + $0x88] sm:$0xf0]  ;;  %v1920_v28 = vld [vmem:[%s2983_s10] sm:$0xf]  ;;  %v2049_v35 = vor.u32 %v2407_v22, %v2048_v21  ;;  %v1989_v36 = vor.u32 %v2390_v23, %v1986_v25 }
  0x52   : > { %811 = vmatpush.bf16.msra.mxu3 %v2077_v62  ;;  %v2436_v29 = vld [vmem:[#allocation8 + $0x74] sm:$0xf]  ;;  %v2170_v30 = vld [vmem:[#allocation8 + $0x78] sm:$0xf0]  ;;  %v2375_v32 = vld [vmem:[%s2983_s10 + $0x4] sm:$0xf0]  ;;  %v2053_v39 = vor.u32 %v2406_v26, %v2050_v27 }
  0x53   : > { %665 = vmatpush.bf16.msra.mxu0 %v2001_v4  ;;  %v2452_v33 = vld [vmem:[#allocation8 + $0xf4] sm:$0xf]  ;;  %v2234_v34 = vld [vmem:[#allocation8 + $0xf8] sm:$0xf0]  ;;  %v2374_v37 = vld [vmem:[%s2983_s10 + $0x4] sm:$0xf]  ;;  %v2173_v40 = vor.u32 %v2436_v29, %v2170_v30  ;;  %v1921_v43 = vor.u32 %v2375_v32, %v1920_v28 }
  0x54   : > { %714 = vmatpush.bf16.msra.mxu1 %v2065_v5  ;;  %v1922_v38 = vld [vmem:[%s2983_s10 + $0x8] sm:$0xf0]  ;;  %v2168_v41 = vld [vmem:[#allocation8 + $0x70] sm:$0xf]  ;;  %v2437_v42 = vld [vmem:[#allocation8 + $0x74] sm:$0xf0]  ;;  %v2237_v44 = vor.u32 %v2452_v33, %v2234_v34 }
  0x55   : > { %763 = vmatpush.bf16.msra.mxu2 %v2005_v6  ;;  %v2232_v45 = vld [vmem:[#allocation8 + $0xf0] sm:$0xf]  ;;  %v2453_v46 = vld [vmem:[#allocation8 + $0xf4] sm:$0xf0]  ;;  %v1925_v47 = vor.u32 %v2374_v37, %v1922_v38  ;;  %v2169_v48 = vor.u32 %v2437_v42, %v2168_v41  ;;  %v2434_v50 = vld [vmem:[#allocation8 + $0x64] sm:$0xf] }
  0x56   : > { %812 = vmatpush.bf16.msra.mxu3 %v2069_v10  ;;  %v2233_v49 = vor.u32 %v2453_v46, %v2232_v45  ;;  %v2162_v51 = vld [vmem:[#allocation8 + $0x68] sm:$0xf0]  ;;  %v2450_v52 = vld [vmem:[#allocation8 + $0xe4] sm:$0xf]  ;;  %v2160_v55 = vld [vmem:[#allocation8 + $0x60] sm:$0xf] }
  0x57   : > { %666 = vmatpush.bf16.msra.mxu0 %v1993_v16  ;;  %v2165_v53 = vor.u32 %v2434_v50, %v2162_v51  ;;  %v2226_v54 = vld [vmem:[#allocation8 + $0xe8] sm:$0xf0]  ;;  %v2435_v56 = vld [vmem:[#allocation8 + $0x64] sm:$0xf0]  ;;  %v2224_v59 = vld [vmem:[#allocation8 + $0xe0] sm:$0xf] }
  0x58   : > { %715 = vmatpush.bf16.msra.mxu1 %v2057_v19  ;;  %v2229_v57 = vor.u32 %v2450_v52, %v2226_v54  ;;  %v2161_v58 = vor.u32 %v2435_v56, %v2160_v55  ;;  %v2451_v60 = vld [vmem:[#allocation8 + $0xe4] sm:$0xf0]  ;;  %v1928_v62 = vld [vmem:[%s2983_s10 + $0x10] sm:$0xf]  ;;  %v2377_v63 = vld [vmem:[%s2983_s10 + $0x14] sm:$0xf0] }
  0x59   : > { %764 = vmatpush.bf16.msra.mxu2 %v1997_v20  ;;  %v2225_v61 = vor.u32 %v2451_v60, %v2224_v59  ;;  %v2376_v0 = vld [vmem:[%s2983_s10 + $0x14] sm:$0xf]  ;;  %v1930_v1 = vld [vmem:[%s2983_s10 + $0x18] sm:$0xf0]  ;;  %v1929_v2 = vor.u32 %v2377_v63, %v1928_v62  ;;  %v1936_v16 = vld [vmem:[%s2983_s10 + $0x20] sm:$0xf] }
  0x5a   : > { %813 = vmatpush.bf16.msra.mxu3 %v2061_v24  ;;  %v1933_v3 = vor.u32 %v2376_v0, %v1930_v1  ;;  %v2432_v4 = vld [vmem:[#allocation8 + $0x54] sm:$0xf]  ;;  %v2154_v5 = vld [vmem:[#allocation8 + $0x58] sm:$0xf0]  ;;  %v2152_v9 = vld [vmem:[#allocation8 + $0x50] sm:$0xf] }
  0x5b   : > { %667 = vmatpush.bf16.msra.mxu0 %v1985_v31  ;;  %v2448_v6 = vld [vmem:[#allocation8 + $0xd4] sm:$0xf]  ;;  %v2157_v7 = vor.u32 %v2432_v4, %v2154_v5  ;;  %v2218_v8 = vld [vmem:[#allocation8 + $0xd8] sm:$0xf0]  ;;  %v2433_v10 = vld [vmem:[#allocation8 + $0x54] sm:$0xf0] }
  0x5c   : > { %716 = vmatpush.bf16.msra.mxu1 %v2049_v35  ;;  %v2221_v11 = vor.u32 %v2448_v6, %v2218_v8  ;;  %v2153_v12 = vor.u32 %v2433_v10, %v2152_v9  ;;  %v2216_v13 = vld [vmem:[#allocation8 + $0xd0] sm:$0xf]  ;;  %v2449_v14 = vld [vmem:[#allocation8 + $0xd4] sm:$0xf0]  ;;  %v2379_v17 = vld [vmem:[%s2983_s10 + $0x24] sm:$0xf0] }
  0x5d   : > { %765 = vmatpush.bf16.msra.mxu2 %v1989_v36  ;;  %v2217_v15 = vor.u32 %v2449_v14, %v2216_v13  ;;  %v2378_v18 = vld [vmem:[%s2983_s10 + $0x24] sm:$0xf]  ;;  %v1938_v19 = vld [vmem:[%s2983_s10 + $0x28] sm:$0xf0]  ;;  %v1937_v20 = vor.u32 %v2379_v17, %v1936_v16  ;;  %v1944_v34 = vld [vmem:[%s2983_s10 + $0x30] sm:$0xf] }
  0x5e   : > { %814 = vmatpush.bf16.msra.mxu3 %v2053_v39  ;;  %668 = vmatmul.bf16.vlgmr.msra.gmra.mxu0 %v1921_v43  ;;  %v1941_v21 = vor.u32 %v2378_v18, %v1938_v19  ;;  %v2430_v22 = vld [vmem:[#allocation8 + $0x44] sm:$0xf]  ;;  %v2146_v23 = vld [vmem:[#allocation8 + $0x48] sm:$0xf0]  ;;  %v2144_v27 = vld [vmem:[#allocation8 + $0x40] sm:$0xf] }
  0x5f   : > { %717 = vmatmul.bf16.vlgmr.msra.gmra.mxu1 %v1925_v47  ;;  %1102 = vmatpush.bf16.msrb.mxu0 %v2169_v48  ;;  %v2446_v24 = vld [vmem:[#allocation8 + $0xc4] sm:$0xf]  ;;  %v2149_v25 = vor.u32 %v2430_v22, %v2146_v23  ;;  %v2210_v26 = vld [vmem:[#allocation8 + $0xc8] sm:$0xf0]  ;;  %v2431_v28 = vld [vmem:[#allocation8 + $0x44] sm:$0xf0] }
  0x60   : > { %766 = vmatmul.bf16.vlgmr.msra.gmra.mxu2 %v1921_v43  ;;  %1151 = vmatpush.bf16.msrb.mxu1 %v2233_v49  ;;  %v2213_v29 = vor.u32 %v2446_v24, %v2210_v26  ;;  %v2145_v30 = vor.u32 %v2431_v28, %v2144_v27  ;;  %v2208_v31 = vld [vmem:[#allocation8 + $0xc0] sm:$0xf]  ;;  %v2447_v32 = vld [vmem:[#allocation8 + $0xc4] sm:$0xf0]  ;;  %v2381_v35 = vld [vmem:[%s2983_s10 + $0x34] sm:$0xf0] }
  0x61   : > { %1200 = vmatpush.bf16.msrb.mxu2 %v2173_v40  ;;  %815 = vmatmul.bf16.vlgmr.msra.gmra.mxu3 %v1925_v47  ;;  %v2209_v33 = vor.u32 %v2447_v32, %v2208_v31  ;;  %v2380_v36 = vld [vmem:[%s2983_s10 + $0x34] sm:$0xf]  ;;  %v1946_v37 = vld [vmem:[%s2983_s10 + $0x38] sm:$0xf0]  ;;  %v1945_v38 = vor.u32 %v2381_v35, %v1944_v34  ;;  %v1952_v52 = vld [vmem:[%s2983_s10 + $0x40] sm:$0xf] }
  0x62   : > { %1249 = vmatpush.bf16.msrb.mxu3 %v2237_v44  ;;  %v1949_v39 = vor.u32 %v2380_v36, %v1946_v37  ;;  %v2428_v40 = vld [vmem:[#allocation8 + $0x34] sm:$0xf]  ;;  %v2138_v41 = vld [vmem:[#allocation8 + $0x38] sm:$0xf0]  ;;  %v2136_v45 = vld [vmem:[#allocation8 + $0x30] sm:$0xf] }
  0x63   : > { %1103 = vmatpush.bf16.msrb.mxu0 %v2161_v58  ;;  %v2444_v42 = vld [vmem:[#allocation8 + $0xb4] sm:$0xf]  ;;  %v2141_v43 = vor.u32 %v2428_v40, %v2138_v41  ;;  %v2202_v44 = vld [vmem:[#allocation8 + $0xb8] sm:$0xf0]  ;;  %v2429_v46 = vld [vmem:[#allocation8 + $0x34] sm:$0xf0] }
  0x64   : > { %1152 = vmatpush.bf16.msrb.mxu1 %v2225_v61  ;;  %v2205_v47 = vor.u32 %v2444_v42, %v2202_v44  ;;  %v2137_v48 = vor.u32 %v2429_v46, %v2136_v45  ;;  %v2200_v49 = vld [vmem:[#allocation8 + $0xb0] sm:$0xf]  ;;  %v2445_v50 = vld [vmem:[#allocation8 + $0xb4] sm:$0xf0]  ;;  %v2382_v54 = vld [vmem:[%s2983_s10 + $0x44] sm:$0xf] }
  0x65   : > { %1201 = vmatpush.bf16.msrb.mxu2 %v2165_v53  ;;  %v2201_v51 = vor.u32 %v2445_v50, %v2200_v49  ;;  %v2383_v53 = vld [vmem:[%s2983_s10 + $0x44] sm:$0xf0]  ;;  %v1954_v55 = vld [vmem:[%s2983_s10 + $0x48] sm:$0xf0]  ;;  %v2128_v63 = vld [vmem:[#allocation8 + $0x20] sm:$0xf] }
  0x66   : > { %1250 = vmatpush.bf16.msrb.mxu3 %v2229_v57  ;;  %v1953_v56 = vor.u32 %v2383_v53, %v1952_v52  ;;  %v1957_v57 = vor.u32 %v2382_v54, %v1954_v55  ;;  %v2426_v58 = vld [vmem:[#allocation8 + $0x24] sm:$0xf]  ;;  %v2130_v59 = vld [vmem:[#allocation8 + $0x28] sm:$0xf0]  ;;  %v2427_v0 = vld [vmem:[#allocation8 + $0x24] sm:$0xf0] }
  0x67   : > { %1104 = vmatpush.bf16.msrb.mxu0 %v2153_v12  ;;  %v2442_v60 = vld [vmem:[#allocation8 + $0xa4] sm:$0xf]  ;;  %v2133_v61 = vor.u32 %v2426_v58, %v2130_v59  ;;  %v2194_v62 = vld [vmem:[#allocation8 + $0xa8] sm:$0xf0]  ;;  %v2443_v4 = vld [vmem:[#allocation8 + $0xa4] sm:$0xf0] }
  0x68   : > { %1153 = vmatpush.bf16.msrb.mxu1 %v2217_v15  ;;  %v2197_v1 = vor.u32 %v2442_v60, %v2194_v62  ;;  %v1960_v6 = vld [vmem:[%s2983_s10 + $0x50] sm:$0xf]  ;;  %v2384_v8 = vld [vmem:[%s2983_s10 + $0x54] sm:$0xf]  ;;  %v1962_v9 = vld [vmem:[%s2983_s10 + $0x58] sm:$0xf0] }
  0x69   : > { %1202 = vmatpush.bf16.msrb.mxu2 %v2157_v7  ;;  %v2385_v7 = vld [vmem:[%s2983_s10 + $0x54] sm:$0xf0]  ;;  %v2122_v13 = vld [vmem:[#allocation8 + $0x18] sm:$0xf0]  ;;  %v2120_v17 = vld [vmem:[#allocation8 + $0x10] sm:$0xf] }
  0x6a   : > { %1251 = vmatpush.bf16.msrb.mxu3 %v2221_v11  ;;  %v1961_v10 = vor.u32 %v2385_v7, %v1960_v6  ;;  %v1965_v11 = vor.u32 %v2384_v8, %v1962_v9  ;;  %v2424_v12 = vld [vmem:[#allocation8 + $0x14] sm:$0xf]  ;;  %v2186_v16 = vld [vmem:[#allocation8 + $0x98] sm:$0xf0]  ;;  %v2425_v18 = vld [vmem:[#allocation8 + $0x14] sm:$0xf0] }
  0x6b   : > { %1105 = vmatpush.bf16.msrb.mxu0 %v2145_v30  ;;  %v2440_v14 = vld [vmem:[#allocation8 + $0x94] sm:$0xf]  ;;  %v2125_v15 = vor.u32 %v2424_v12, %v2122_v13  ;;  %v2441_v22 = vld [vmem:[#allocation8 + $0x94] sm:$0xf0]  ;;  %v1968_v24 = vld [vmem:[%s2983_s10 + $0x60] sm:$0xf] }
  0x6c   : > { %1154 = vmatpush.bf16.msrb.mxu1 %v2209_v33  ;;  %v2189_v19 = vor.u32 %v2440_v14, %v2186_v16  ;;  %v2386_v26 = vld [vmem:[%s2983_s10 + $0x64] sm:$0xf]  ;;  %v1970_v27 = vld [vmem:[%s2983_s10 + $0x68] sm:$0xf0]  ;;  %v1976_v33 = vld [vmem:[%s2983_s10 + $0x70] sm:$0xf] }
  0x6d   : > { %1203 = vmatpush.bf16.msrb.mxu2 %v2149_v25  ;;  %v2387_v25 = vld [vmem:[%s2983_s10 + $0x64] sm:$0xf0]  ;;  %v2114_v31 = vld [vmem:[#allocation8 + $0x8] sm:$0xf0]  ;;  %v2389_v34 = vld [vmem:[%s2983_s10 + $0x74] sm:$0xf0] }
  0x6e   : > { %673 = vmatmul.bf16.gmra.mxu0 %v1929_v2  ;;  %1252 = vmatpush.bf16.msrb.mxu3 %v2213_v29  ;;  %v1969_v28 = vor.u32 %v2387_v25, %v1968_v24  ;;  %v1973_v29 = vor.u32 %v2386_v26, %v1970_v27  ;;  %v2422_v30 = vld [vmem:[#allocation8 + $0x4] sm:$0xf]  ;;  %v2388_v35 = vld [vmem:[%s2983_s10 + $0x74] sm:$0xf]  ;;  %v1978_v36 = vld [vmem:[%s2983_s10 + $0x78] sm:$0xf0]  ;;  %v1977_v45 = vor.u32 %v2389_v34, %v1976_v33 }
  0x6f   : > { %722 = vmatmul.bf16.gmra.mxu1 %v1933_v3  ;;  %1106 = vmatpush.bf16.msrb.mxu0 %v2137_v48  ;;  %v2117_v32 = vor.u32 %v2422_v30, %v2114_v31  ;;  %v2438_v37 = vld [vmem:[#allocation8 + $0x84] sm:$0xf]  ;;  %v2112_v40 = vld [vmem:[#allocation8] sm:$0xf]  ;;  %v2423_v41 = vld [vmem:[#allocation8 + $0x4] sm:$0xf0] }
  0x70   : > { %771 = vmatmul.bf16.gmra.mxu2 %v1929_v2  ;;  %1155 = vmatpush.bf16.msrb.mxu1 %v2201_v51  ;;  %v2129_v2 = vor.u32 %v2427_v0, %v2128_v63  ;;  %v2176_v42 = vld [vmem:[#allocation8 + $0x80] sm:$0xf]  ;;  %v2439_v44 = vld [vmem:[#allocation8 + $0x84] sm:$0xf0]  ;;  %v414_v48 = vld [vmem:[#allocation7] sm:$0x3] }
  0x71   : > { %820 = vmatmul.bf16.gmra.mxu3 %v1933_v3  ;;  %1204 = vmatpush.bf16.msrb.mxu2 %v2141_v43  ;;  %v2192_v3 = vld [vmem:[#allocation8 + $0xa0] sm:$0xf]  ;;  %v2113_v43 = vor.u32 %v2423_v41, %v2112_v40  ;;  %v2177_v46 = vor.u32 %v2439_v44, %v2176_v42  ;;  %v3029_v50 = vperm.slane %v414_v48, 0  ;;  %v3032_v54 = vperm.slane %v414_v48, 1  ;;  %v2468_v62 = vld [vmem:[#allocation10 + $0x74] sm:$0xf] }
  0x72   : > { %1253 = vmatpush.bf16.msrb.mxu3 %v2205_v47  ;;  %v2193_v5 = vor.u32 %v2443_v4, %v2192_v3  ;;  %v1981_v47 = vor.u32 %v2388_v35, %v1978_v36  ;;  %v2298_v63 = vld [vmem:[#allocation10 + $0x78] sm:$0xf0]  ;;  %v2484_v3 = vld [vmem:[#allocation10 + $0xf4] sm:$0xf]  ;;  %v2296_v6 = vld [vmem:[#allocation10 + $0x70] sm:$0xf] }
  0x73   : > { %1107 = vmatpush.bf16.msrb.mxu0 %v2129_v2  ;;  %v2301_v2 = vor.u32 %v2468_v62, %v2298_v63  ;;  %v2362_v4 = vld [vmem:[#allocation10 + $0xf8] sm:$0xf0]  ;;  %v2469_v7 = vld [vmem:[#allocation10 + $0x74] sm:$0xf0]  ;;  %v2290_v33 = vld [vmem:[#allocation10 + $0x68] sm:$0xf0] }
  0x74   : > { %1156 = vmatpush.bf16.msrb.mxu1 %v2193_v5  ;;  %v2365_v5 = vor.u32 %v2484_v3, %v2362_v4  ;;  %v2288_v40 = vld [vmem:[#allocation10 + $0x60] sm:$0xf]  ;;  %v2467_v41 = vld [vmem:[#allocation10 + $0x64] sm:$0xf0]  ;;  %v2464_v4 = vld [vmem:[#allocation10 + $0x54] sm:$0xf] }
  0x75   : > { %1205 = vmatpush.bf16.msrb.mxu2 %v2133_v61  ;;  %v2289_v44 = vor.u32 %v2467_v41, %v2288_v40  ;;  %s1917_s23 = sshll.u32 %s2979_s11, 8  ;;  %s2487_s13 = sshll.u32 %s2874_s28, 8 }
  0x76   : > { %1254 = vmatpush.bf16.msrb.mxu3 %v2197_v1  ;;  %s3113_s22 = scalar_lea.vmem [#allocation11], %s1917_s23  ;;  %s1785_s15 = scalar_lea.hbm %s3219_s7, %s2487_s13 }
  0x77   : > { %s1786_s17 = sshll.u32 %s3113_s22, 4  ;;  %s1788_s20 = sshll.u32 %s1785_s15, 4  ;;  %s1787_s17 = int_to_ptr.vmem [resolvable:$true] %s1786_s17  ;;  %s1789_s20 = int_to_ptr.hbm [resolvable:$true] %s1788_s20 }
  0x78   : > { %s1773_s28 = scalar_lea.sflag [#allocation4], %s2979_s11  ;;  %s2743_s1 = sshra.s32 %s1789_s20, 4  ;;  %s2744_s1 = int_to_ptr.hbm [resolvable:$true] %s2743_s1 }
  0x79   : > { %1206 = vmatpush.bf16.msrb.mxu2 %v2125_v15  ;;  %s2745_s10 = scalar_lea.hbm %s2744_s1, 256  ;;  %s2749_s19 = scalar_lea.hbm %s3219_s7, 512 }
  0x7a   : > { %1255 = vmatpush.bf16.msrb.mxu3 %v2189_v19  ;;  %v2360_v19 = vld [vmem:[#allocation10 + $0xf0] sm:$0xf]  ;;  %p2746_p1 = scmp.ne.s32.totalorder %s2744_s1, %s2745_s10  ;;  %p2750_p11 = scmp.lt.s32.totalorder %s2744_s1, %s3219_s7 }
  0x7b   : > { %p2751_p2 = scmp.lt.s32.totalorder %s2749_s19, %s2745_s10 }
  0x7c   : > { %p2747_p4 = pnand %p2746_p1, %p2946_p3 }
  0x7d   : > { %1207 = vmatpush.bf16.msrb.mxu2 %v2117_v32  ;;  %v2466_v32 = vld [vmem:[#allocation10 + $0x64] sm:$0xf]  ;;  %p2752_p9 = por %p2751_p2, %p2750_p11 }
  0x7e   : > { %678 = vmatmul.bf16.gmra.mxu0 %v1937_v20  ;;  %v2293_v36 = vor.u32 %v2466_v32, %v2290_v33  ;;  %p2748_p8 = pneg %p2747_p4 }
  0x7f   : > { %727 = vmatmul.bf16.gmra.mxu1 %v1941_v21 }
  0x80   : > { %776 = vmatmul.bf16.gmra.mxu2 %v1937_v20  ;;  %v2121_v20 = vor.u32 %v2425_v18, %v2120_v17  ;;  %p2753_p10 = pnand %p2752_p9, %p2748_p8 }
  0x81   : > { %825 = vmatmul.bf16.gmra.mxu3 %v1941_v21  ;;  %v2184_v21 = vld [vmem:[#allocation8 + $0x90] sm:$0xf]  ;;  %1642 = vmatpush.bf16.msra.mxu2 %v2301_v2 }
  0x82   : > { %v2185_v23 = vor.u32 %v2441_v22, %v2184_v21  ;;  %1108 = vmatpush.bf16.msrb.mxu0 %v2121_v20  ;;  %v2485_v20 = vld [vmem:[#allocation10 + $0xf4] sm:$0xf0] }
  0x83   : > { %v2361_v22 = vor.u32 %v2485_v20, %v2360_v19 }
  0x84   : > { %1157 = vmatpush.bf16.msrb.mxu1 %v2185_v23 }
  0x85   : > { %1643 = vmatpush.bf16.msra.mxu2 %v2293_v36 }
  0x86   : > { %1109 = vmatpush.bf16.msrb.mxu0 %v2113_v43 }
  0x88   : > { %1158 = vmatpush.bf16.msrb.mxu1 %v2177_v46 }
  0x8c   : > { %1593 = vmatpush.bf16.msra.mxu1 %v2361_v22 }
  0x8e   : > { %683 = vmatmul.bf16.gmra.mxu0 %v1945_v38 }
  0x8f   : > { %732 = vmatmul.bf16.gmra.mxu1 %v1949_v39 }
  0x90   : > { %781 = vmatmul.bf16.gmra.mxu2 %v1945_v38  ;;  %v2178_v38 = vld [vmem:[#allocation8 + $0x88] sm:$0xf0] }
  0x91   : > { %830 = vmatmul.bf16.gmra.mxu3 %v1949_v39  ;;  %v2181_v39 = vor.u32 %v2438_v37, %v2178_v38  ;;  %v2482_v37 = vld [vmem:[#allocation10 + $0xe4] sm:$0xf]  ;;  %v2354_v38 = vld [vmem:[#allocation10 + $0xe8] sm:$0xf0] }
  0x93   : > { %1256 = vmatpush.bf16.msrb.mxu3 %v2181_v39  ;;  %v2357_v39 = vor.u32 %v2482_v37, %v2354_v38  ;;  %v2462_v38 = vld [vmem:[#allocation10 + $0x44] sm:$0xf] }
  0x97   : > { %1691 = vmatpush.bf16.msra.mxu3 %v2365_v5  ;;  %v2282_v5 = vld [vmem:[#allocation10 + $0x58] sm:$0xf0] }
  0x9b   : > { %1692 = vmatpush.bf16.msra.mxu3 %v2357_v39  ;;  %v2274_v39 = vld [vmem:[#allocation10 + $0x48] sm:$0xf0] }
  0x9e   : > { %688 = vmatmul.bf16.gmra.mxu0 %v1953_v56 }
  0x9f   : > { %737 = vmatmul.bf16.gmra.mxu1 %v1957_v57 }
  0xa0   : > { %786 = vmatmul.bf16.gmra.mxu2 %v1953_v56 }
  0xa1   : > { %835 = vmatmul.bf16.gmra.mxu3 %v1957_v57 }
  0xae   : > { %693 = vmatmul.bf16.gmra.mxu0 %v1961_v10 }
  0xaf   : > { %742 = vmatmul.bf16.gmra.mxu1 %v1965_v11 }
  0xb0   : > { %791 = vmatmul.bf16.gmra.mxu2 %v1961_v10  ;;  %v2297_v10 = vor.u32 %v2469_v7, %v2296_v6 }
  0xb1   : > { %840 = vmatmul.bf16.gmra.mxu3 %v1965_v11 }
  0xb2   : > { %1544 = vmatpush.bf16.msra.mxu0 %v2297_v10  ;;  %v2346_v10 = vld [vmem:[#allocation10 + $0xd8] sm:$0xf0] }
  0xb6   : > { %1545 = vmatpush.bf16.msra.mxu0 %v2289_v44  ;;  %v2338_v44 = vld [vmem:[#allocation10 + $0xc8] sm:$0xf0] }
  0xbe   : > { %698 = vmatmul.bf16.gmra.mxu0 %v1969_v28 }
  0xbf   : > { %747 = vmatmul.bf16.gmra.mxu1 %v1973_v29 }
  0xc0   : > { %796 = vmatmul.bf16.gmra.mxu2 %v1969_v28 }
  0xc1   : > { %845 = vmatmul.bf16.gmra.mxu3 %v1973_v29 }
  0xce   : > { %703 = vmatmul.bf16.gmra.mxu0 %v1977_v45 }
  0xcf   : > { %752 = vmatmul.bf16.gmra.mxu1 %v1981_v47 }
  0xd0   : > { %801 = vmatmul.bf16.gmra.mxu2 %v1977_v45 }
  0xd1   : > { %850 = vmatmul.bf16.gmra.mxu3 %v1981_v47 }
  0xdb   : > { %v669_v49 = vpop.f32.mrf.mxu0 }
  0xdc   : > { %v718_v51 = vpop.f32.mrf.mxu1  ;;  %v670_v52 = vadd.f32 %v669_v49, %v3029_v50 }
  0xde   : > { %v719_v57 = vadd.f32 %v718_v51, %v670_v52 }
  0xe0   : > { %v856_v0 = vmax.f32 %v719_v57, 0.0 }
  0xe3   : > { %v767_v53 = vpop.f32.mrf.mxu2  ;;  %v671_v56 = vpop.f32.mrf.mxu0 }
  0xe4   : > { %v816_v55 = vpop.f32.mrf.mxu3  ;;  %v672_v58 = vadd.f32 %v671_v56, %v3029_v50  ;;  %v720_v59 = vpop.f32.mrf.mxu1  ;;  %v768_v61 = vadd.f32 %v767_v53, %v3032_v54  ;;  %v2483_v56 = vld [vmem:[#allocation10 + $0xe4] sm:$0xf0] }
  0xe6   : > { %v721_v60 = vadd.f32 %v720_v59, %v672_v58  ;;  %v817_v11 = vadd.f32 %v816_v55, %v768_v61  ;;  %v2352_v55 = vld [vmem:[#allocation10 + $0xe0] sm:$0xf] }
  0xe7   : > { %v2353_v58 = vor.u32 %v2483_v56, %v2352_v55 }
  0xe8   : > { %v858_v1 = vmax.f32 %v721_v60, 0.0  ;;  %v857_v17 = vmax.f32 %v817_v11, 0.0 }
  0xe9   : > { %1594 = vmatpush.bf16.msra.mxu1 %v2353_v58 }
  0xea   : > { %v888_v9 = vpack.c.bf16 %v858_v1, %v856_v0 }
  0xeb   : > { %v769_v8 = vpop.f32.mrf.mxu2  ;;  %v674_v14 = vpop.f32.mrf.mxu0 }
  0xec   : > { %v770_v12 = vadd.f32 %v769_v8, %v3032_v54  ;;  %v818_v13 = vpop.f32.mrf.mxu3  ;;  %v723_v15 = vpop.f32.mrf.mxu1  ;;  %1110 = vmatmul.bf16.vlgmr.msrb.gmra.mxu0 %v888_v9  ;;  %1208 = vmatmul.bf16.vlgmr.msrb.gmra.mxu2 %v888_v9  ;;  %v675_v21 = vadd.f32 %v674_v14, %v3029_v50  ;;  %v2285_v8 = vor.u32 %v2464_v4, %v2282_v5  ;;  %v2480_v9 = vld [vmem:[#allocation10 + $0xd4] sm:$0xf] }
  0xed   : > { %v2349_v11 = vor.u32 %v2480_v9, %v2346_v10  ;;  %v2460_v10 = vld [vmem:[#allocation10 + $0x34] sm:$0xf] }
  0xee   : > { %v819_v16 = vadd.f32 %v818_v13, %v770_v12  ;;  %v724_v27 = vadd.f32 %v723_v15, %v675_v21  ;;  %v2280_v12 = vld [vmem:[#allocation10 + $0x50] sm:$0xf]  ;;  %v2465_v13 = vld [vmem:[#allocation10 + $0x54] sm:$0xf0]  ;;  %1644 = vmatpush.bf16.msra.mxu2 %v2285_v8 }
  0xef   : > { %1693 = vmatpush.bf16.msra.mxu3 %v2349_v11  ;;  %v2266_v11 = vld [vmem:[#allocation10 + $0x38] sm:$0xf0] }
  0xf0   : > { %v859_v18 = vmax.f32 %v819_v16, 0.0  ;;  %v860_v34 = vmax.f32 %v724_v27, 0.0  ;;  %v2281_v16 = vor.u32 %v2465_v13, %v2280_v12 }
  0xf2   : > { %v889_v23 = vpack.c.bf16 %v859_v18, %v857_v17  ;;  %1546 = vmatpush.bf16.msra.mxu0 %v2281_v16  ;;  %v2330_v16 = vld [vmem:[#allocation10 + $0xb8] sm:$0xf0] }
  0xf3   : > { %v772_v24 = vpop.f32.mrf.mxu2  ;;  %v676_v26 = vpop.f32.mrf.mxu0 }
  0xf4   : > { %v821_v25 = vpop.f32.mrf.mxu3  ;;  %1159 = vmatmul.bf16.vlgmr.msrb.gmra.mxu1 %v889_v23  ;;  %1257 = vmatmul.bf16.vlgmr.msrb.gmra.mxu3 %v889_v23  ;;  %v677_v28 = vadd.f32 %v676_v26, %v3029_v50  ;;  %v725_v29 = vpop.f32.mrf.mxu1  ;;  %v773_v31 = vadd.f32 %v772_v24, %v3032_v54  ;;  %v2481_v26 = vld [vmem:[#allocation10 + $0xd4] sm:$0xf0] }
  0xf6   : > { %v726_v30 = vadd.f32 %v725_v29, %v677_v28  ;;  %v822_v45 = vadd.f32 %v821_v25, %v773_v31  ;;  %v2344_v25 = vld [vmem:[#allocation10 + $0xd0] sm:$0xf] }
  0xf7   : > { %v2345_v28 = vor.u32 %v2481_v26, %v2344_v25 }
  0xf8   : > { %v862_v35 = vmax.f32 %v726_v30, 0.0  ;;  %v861_v52 = vmax.f32 %v822_v45, 0.0 }
  0xf9   : > { %1595 = vmatpush.bf16.msra.mxu1 %v2345_v28 }
  0xfa   : > { %v890_v43 = vpack.c.bf16 %v862_v35, %v860_v34 }
  0xfb   : > { %v774_v42 = vpop.f32.mrf.mxu2  ;;  %v679_v48 = vpop.f32.mrf.mxu0 }
  0xfc   : > { %v775_v46 = vadd.f32 %v774_v42, %v3032_v54  ;;  %v823_v47 = vpop.f32.mrf.mxu3  ;;  %v728_v49 = vpop.f32.mrf.mxu1  ;;  %1115 = vmatmul.bf16.gmra.mxu0 %v890_v43  ;;  %1213 = vmatmul.bf16.gmra.mxu2 %v890_v43  ;;  %v680_v57 = vadd.f32 %v679_v48, %v3029_v50  ;;  %v2277_v42 = vor.u32 %v2462_v38, %v2274_v39  ;;  %v2478_v43 = vld [vmem:[#allocation10 + $0xc4] sm:$0xf] }
  0xfd   : > { %v2341_v45 = vor.u32 %v2478_v43, %v2338_v44  ;;  %v2458_v44 = vld [vmem:[#allocation10 + $0x24] sm:$0xf] }
  0xfe   : > { %v824_v51 = vadd.f32 %v823_v47, %v775_v46  ;;  %v729_v63 = vadd.f32 %v728_v49, %v680_v57  ;;  %v2272_v46 = vld [vmem:[#allocation10 + $0x40] sm:$0xf]  ;;  %v2463_v47 = vld [vmem:[#allocation10 + $0x44] sm:$0xf0]  ;;  %1645 = vmatpush.bf16.msra.mxu2 %v2277_v42 }
  0xff   : > { %1694 = vmatpush.bf16.msra.mxu3 %v2341_v45  ;;  %v2258_v45 = vld [vmem:[#allocation10 + $0x28] sm:$0xf0] }
 0x100   : > { %v863_v53 = vmax.f32 %v824_v51, 0.0  ;;  %v864_v6 = vmax.f32 %v729_v63, 0.0  ;;  %v2273_v51 = vor.u32 %v2463_v47, %v2272_v46 }
 0x102   : > { %v891_v59 = vpack.c.bf16 %v863_v53, %v861_v52  ;;  %1547 = vmatpush.bf16.msra.mxu0 %v2273_v51  ;;  %v2322_v51 = vld [vmem:[#allocation10 + $0xa8] sm:$0xf0] }
 0x103   : > { %v777_v60 = vpop.f32.mrf.mxu2  ;;  %v681_v62 = vpop.f32.mrf.mxu0 }
 0x104   : > { %v826_v61 = vpop.f32.mrf.mxu3  ;;  %1164 = vmatmul.bf16.gmra.mxu1 %v891_v59  ;;  %1262 = vmatmul.bf16.gmra.mxu3 %v891_v59  ;;  %v682_v0 = vadd.f32 %v681_v62, %v3029_v50  ;;  %v730_v1 = vpop.f32.mrf.mxu1  ;;  %v778_v3 = vadd.f32 %v777_v60, %v3032_v54  ;;  %v2479_v62 = vld [vmem:[#allocation10 + $0xc4] sm:$0xf0] }
 0x106   : > { %v731_v2 = vadd.f32 %v730_v1, %v682_v0  ;;  %v827_v17 = vadd.f32 %v826_v61, %v778_v3  ;;  %v2336_v61 = vld [vmem:[#allocation10 + $0xc0] sm:$0xf] }
 0x107   : > { %v2337_v0 = vor.u32 %v2479_v62, %v2336_v61 }
 0x108   : > { %v866_v7 = vmax.f32 %v731_v2, 0.0  ;;  %v865_v23 = vmax.f32 %v827_v17, 0.0 }
 0x109   : > { %1596 = vmatpush.bf16.msra.mxu1 %v2337_v0 }
 0x10a   : > { %v892_v15 = vpack.c.bf16 %v866_v7, %v864_v6 }
 0x10b   : > { %v779_v14 = vpop.f32.mrf.mxu2  ;;  %v684_v20 = vpop.f32.mrf.mxu0 }
 0x10c   : > { %v780_v18 = vadd.f32 %v779_v14, %v3032_v54  ;;  %v828_v19 = vpop.f32.mrf.mxu3  ;;  %v733_v21 = vpop.f32.mrf.mxu1  ;;  %1120 = vmatmul.bf16.gmra.mxu0 %v892_v15  ;;  %1218 = vmatmul.bf16.gmra.mxu2 %v892_v15  ;;  %v685_v27 = vadd.f32 %v684_v20, %v3029_v50  ;;  %v2269_v14 = vor.u32 %v2460_v10, %v2266_v11  ;;  %v2476_v15 = vld [vmem:[#allocation10 + $0xb4] sm:$0xf] }
 0x10d   : > { %v2333_v17 = vor.u32 %v2476_v15, %v2330_v16  ;;  %v2456_v11 = vld [vmem:[#allocation10 + $0x14] sm:$0xf] }
 0x10e   : > { %v829_v22 = vadd.f32 %v828_v19, %v780_v18  ;;  %v734_v33 = vadd.f32 %v733_v21, %v685_v27  ;;  %v2264_v18 = vld [vmem:[#allocation10 + $0x30] sm:$0xf]  ;;  %v2461_v19 = vld [vmem:[#allocation10 + $0x34] sm:$0xf0]  ;;  %1646 = vmatpush.bf16.msra.mxu2 %v2269_v14 }
 0x10f   : > { %1695 = vmatpush.bf16.msra.mxu3 %v2333_v17 }
 0x110   : > { %v867_v24 = vmax.f32 %v829_v22, 0.0  ;;  %v868_v40 = vmax.f32 %v734_v33, 0.0  ;;  %v2265_v22 = vor.u32 %v2461_v19, %v2264_v18  ;;  %v2314_v18 = vld [vmem:[#allocation10 + $0x98] sm:$0xf0]  ;;  %v2248_v19 = vld [vmem:[#allocation10 + $0x10] sm:$0xf] }
 0x112   : > { %v893_v29 = vpack.c.bf16 %v867_v24, %v865_v23  ;;  %1548 = vmatpush.bf16.msra.mxu0 %v2265_v22 }
 0x113   : > { %v782_v30 = vpop.f32.mrf.mxu2  ;;  %v686_v32 = vpop.f32.mrf.mxu0 }
 0x114   : > { %v831_v31 = vpop.f32.mrf.mxu3  ;;  %1169 = vmatmul.bf16.gmra.mxu1 %v893_v29  ;;  %1267 = vmatmul.bf16.gmra.mxu3 %v893_v29  ;;  %v687_v34 = vadd.f32 %v686_v32, %v3029_v50  ;;  %v735_v35 = vpop.f32.mrf.mxu1  ;;  %v783_v37 = vadd.f32 %v782_v30, %v3032_v54  ;;  %v2477_v32 = vld [vmem:[#allocation10 + $0xb4] sm:$0xf0] }
 0x116   : > { %v736_v36 = vadd.f32 %v735_v35, %v687_v34  ;;  %v832_v52 = vadd.f32 %v831_v31, %v783_v37  ;;  %v2328_v31 = vld [vmem:[#allocation10 + $0xb0] sm:$0xf] }
 0x117   : > { %v2329_v34 = vor.u32 %v2477_v32, %v2328_v31 }
 0x118   : > { %v870_v41 = vmax.f32 %v736_v36, 0.0  ;;  %v869_v59 = vmax.f32 %v832_v52, 0.0 }
 0x119   : > { %1597 = vmatpush.bf16.msra.mxu1 %v2329_v34 }
 0x11a   : > { %v894_v49 = vpack.c.bf16 %v870_v41, %v868_v40 }
 0x11b   : > { %v784_v48 = vpop.f32.mrf.mxu2  ;;  %v689_v56 = vpop.f32.mrf.mxu0 }
 0x11c   : > { %v785_v53 = vadd.f32 %v784_v48, %v3032_v54  ;;  %v833_v55 = vpop.f32.mrf.mxu3  ;;  %v738_v57 = vpop.f32.mrf.mxu1  ;;  %1125 = vmatmul.bf16.gmra.mxu0 %v894_v49  ;;  %1223 = vmatmul.bf16.gmra.mxu2 %v894_v49  ;;  %v690_v63 = vadd.f32 %v689_v56, %v3029_v50  ;;  %v2261_v48 = vor.u32 %v2458_v44, %v2258_v45  ;;  %v2474_v49 = vld [vmem:[#allocation10 + $0xa4] sm:$0xf] }
 0x11d   : > { %v2325_v52 = vor.u32 %v2474_v49, %v2322_v51  ;;  %v2454_v45 = vld [vmem:[#allocation10 + $0x4] sm:$0xf] }
 0x11e   : > { %v834_v58 = vadd.f32 %v833_v55, %v785_v53  ;;  %v739_v5 = vadd.f32 %v738_v57, %v690_v63  ;;  %v2256_v53 = vld [vmem:[#allocation10 + $0x20] sm:$0xf]  ;;  %v2459_v55 = vld [vmem:[#allocation10 + $0x24] sm:$0xf0]  ;;  %1647 = vmatpush.bf16.msra.mxu2 %v2261_v48 }
 0x11f   : > { %1696 = vmatpush.bf16.msra.mxu3 %v2325_v52  ;;  %v2306_v52 = vld [vmem:[#allocation10 + $0x88] sm:$0xf0] }
 0x120   : > { %v871_v60 = vmax.f32 %v834_v58, 0.0  ;;  %v872_v12 = vmax.f32 %v739_v5, 0.0  ;;  %v2257_v58 = vor.u32 %v2459_v55, %v2256_v53 }
 0x122   : > { %v895_v1 = vpack.c.bf16 %v871_v60, %v869_v59  ;;  %1549 = vmatpush.bf16.msra.mxu0 %v2257_v58 }
 0x123   : > { %v787_v2 = vpop.f32.mrf.mxu2  ;;  %v691_v4 = vpop.f32.mrf.mxu0 }
 0x124   : > { %v836_v3 = vpop.f32.mrf.mxu3  ;;  %1174 = vmatmul.bf16.gmra.mxu1 %v895_v1  ;;  %1272 = vmatmul.bf16.gmra.mxu3 %v895_v1  ;;  %v692_v6 = vadd.f32 %v691_v4, %v3029_v50  ;;  %v740_v7 = vpop.f32.mrf.mxu1  ;;  %v788_v9 = vadd.f32 %v787_v2, %v3032_v54  ;;  %v2475_v4 = vld [vmem:[#allocation10 + $0xa4] sm:$0xf0] }
 0x126   : > { %v741_v8 = vadd.f32 %v740_v7, %v692_v6  ;;  %v837_v23 = vadd.f32 %v836_v3, %v788_v9  ;;  %v2320_v3 = vld [vmem:[#allocation10 + $0xa0] sm:$0xf] }
 0x127   : > { %v2321_v6 = vor.u32 %v2475_v4, %v2320_v3  ;;  %v2304_v4 = vld [vmem:[#allocation10 + $0x80] sm:$0xf] }
 0x128   : > { %v874_v13 = vmax.f32 %v741_v8, 0.0  ;;  %v873_v29 = vmax.f32 %v837_v23, 0.0 }
 0x129   : > { %1598 = vmatpush.bf16.msra.mxu1 %v2321_v6 }
 0x12a   : > { %v896_v21 = vpack.c.bf16 %v874_v13, %v872_v12  ;;  %v2250_v12 = vld [vmem:[#allocation10 + $0x18] sm:$0xf0]  ;;  %v2472_v13 = vld [vmem:[#allocation10 + $0x94] sm:$0xf] }
 0x12b   : > { %v789_v20 = vpop.f32.mrf.mxu2  ;;  %v694_v26 = vpop.f32.mrf.mxu0  ;;  %v2253_v17 = vor.u32 %v2456_v11, %v2250_v12 }
 0x12c   : > { %v790_v24 = vadd.f32 %v789_v20, %v3032_v54  ;;  %v838_v25 = vpop.f32.mrf.mxu3  ;;  %v743_v27 = vpop.f32.mrf.mxu1  ;;  %1130 = vmatmul.bf16.gmra.mxu0 %v896_v21  ;;  %1228 = vmatmul.bf16.gmra.mxu2 %v896_v21  ;;  %v695_v33 = vadd.f32 %v694_v26, %v3029_v50  ;;  %v2457_v20 = vld [vmem:[#allocation10 + $0x14] sm:$0xf0]  ;;  %v2317_v21 = vor.u32 %v2472_v13, %v2314_v18 }
 0x12d   : > { %v2249_v22 = vor.u32 %v2457_v20, %v2248_v19  ;;  %1648 = vmatpush.bf16.msra.mxu2 %v2253_v17 }
 0x12e   : > { %v839_v28 = vadd.f32 %v838_v25, %v790_v24  ;;  %v744_v39 = vadd.f32 %v743_v27, %v695_v33  ;;  %1697 = vmatpush.bf16.msra.mxu3 %v2317_v21 }
 0x12f   : > { %1550 = vmatpush.bf16.msra.mxu0 %v2249_v22 }
 0x130   : > { %v875_v30 = vmax.f32 %v839_v28, 0.0  ;;  %v876_v46 = vmax.f32 %v744_v39, 0.0 }
 0x132   : > { %v897_v35 = vpack.c.bf16 %v875_v30, %v873_v29  ;;  %v2312_v29 = vld [vmem:[#allocation10 + $0x90] sm:$0xf]  ;;  %v2473_v30 = vld [vmem:[#allocation10 + $0x94] sm:$0xf0] }
 0x133   : > { %v792_v36 = vpop.f32.mrf.mxu2  ;;  %v696_v38 = vpop.f32.mrf.mxu0 }
 0x134   : > { %v841_v37 = vpop.f32.mrf.mxu3  ;;  %1179 = vmatmul.bf16.gmra.mxu1 %v897_v35  ;;  %1277 = vmatmul.bf16.gmra.mxu3 %v897_v35  ;;  %v697_v40 = vadd.f32 %v696_v38, %v3029_v50  ;;  %v745_v41 = vpop.f32.mrf.mxu1  ;;  %v793_v43 = vadd.f32 %v792_v36, %v3032_v54  ;;  %v2313_v35 = vor.u32 %v2473_v30, %v2312_v29 }
 0x136   : > { %v746_v42 = vadd.f32 %v745_v41, %v697_v40  ;;  %v842_v59 = vadd.f32 %v841_v37, %v793_v43  ;;  %1599 = vmatpush.bf16.msra.mxu1 %v2313_v35 }
 0x138   : > { %v878_v47 = vmax.f32 %v746_v42, 0.0  ;;  %v877_v1 = vmax.f32 %v842_v59, 0.0 }
 0x13a   : > { %v898_v57 = vpack.c.bf16 %v878_v47, %v876_v46  ;;  %v2242_v46 = vld [vmem:[#allocation10 + $0x8] sm:$0xf0]  ;;  %v2470_v47 = vld [vmem:[#allocation10 + $0x84] sm:$0xf] }
 0x13b   : > { %v794_v56 = vpop.f32.mrf.mxu2  ;;  %v699_v62 = vpop.f32.mrf.mxu0  ;;  %v2245_v51 = vor.u32 %v2454_v45, %v2242_v46  ;;  %v2309_v55 = vor.u32 %v2470_v47, %v2306_v52 }
 0x13c   : > { %v795_v60 = vadd.f32 %v794_v56, %v3032_v54  ;;  %v843_v61 = vpop.f32.mrf.mxu3  ;;  %v748_v63 = vpop.f32.mrf.mxu1  ;;  %1135 = vmatmul.bf16.gmra.mxu0 %v898_v57  ;;  %1233 = vmatmul.bf16.gmra.mxu2 %v898_v57  ;;  %v700_v5 = vadd.f32 %v699_v62, %v3029_v50  ;;  %v2240_v62 = vld [vmem:[#allocation10] sm:$0xf] }
 0x13d   : > { %1649 = vmatpush.bf16.msra.mxu2 %v2245_v51  ;;  %1698 = vmatpush.bf16.msra.mxu3 %v2309_v55 }
 0x13e   : > { %v844_v0 = vadd.f32 %v843_v61, %v795_v60  ;;  %v749_v14 = vadd.f32 %v748_v63, %v700_v5  ;;  %v2455_v63 = vld [vmem:[#allocation10 + $0x4] sm:$0xf0] }
 0x13f   : > { %v2471_v5 = vld [vmem:[#allocation10 + $0x84] sm:$0xf0] }
 0x140   : > { %v879_v2 = vmax.f32 %v844_v0, 0.0  ;;  %v880_v25 = vmax.f32 %v749_v14, 0.0  ;;  %v2305_v6 = vor.u32 %v2471_v5, %v2304_v4 }
 0x142   : > { %v899_v7 = vpack.c.bf16 %v879_v2, %v877_v1  ;;  %v2241_v2 = vor.u32 %v2455_v63, %v2240_v62  ;;  %1600 = vmatpush.bf16.msra.mxu1 %v2305_v6 }
 0x143   : > { %v797_v8 = vpop.f32.mrf.mxu2  ;;  %v701_v10 = vpop.f32.mrf.mxu0 }
 0x144   : > { %v846_v9 = vpop.f32.mrf.mxu3  ;;  %1184 = vmatmul.bf16.gmra.mxu1 %v899_v7  ;;  %1282 = vmatmul.bf16.gmra.mxu3 %v899_v7  ;;  %v702_v15 = vadd.f32 %v701_v10, %v3029_v50  ;;  %v750_v16 = vpop.f32.mrf.mxu1  ;;  %v798_v24 = vadd.f32 %v797_v8, %v3032_v54 }
 0x145   : > { %1551 = vmatpush.bf16.msra.mxu0 %v2241_v2 }
 0x146   : > { %v751_v23 = vadd.f32 %v750_v16, %v702_v15  ;;  %v847_v31 = vadd.f32 %v846_v9, %v798_v24 }
 0x148   : > { %v882_v26 = vmax.f32 %v751_v23, 0.0  ;;  %v881_v38 = vmax.f32 %v847_v31, 0.0 }
 0x14a   : > { %v900_v28 = vpack.c.bf16 %v882_v26, %v880_v25 }
 0x14b   : > { %v799_v27 = vpop.f32.mrf.mxu2  ;;  %v704_v34 = vpop.f32.mrf.mxu0 }
 0x14c   : > { %v800_v32 = vadd.f32 %v799_v27, %v3032_v54  ;;  %v848_v33 = vpop.f32.mrf.mxu3  ;;  %v753_v36 = vpop.f32.mrf.mxu1  ;;  %1140 = vmatmul.bf16.gmra.mxu0 %v900_v28  ;;  %1238 = vmatmul.bf16.gmra.mxu2 %v900_v28  ;;  %v705_v40 = vadd.f32 %v704_v34, %v3029_v50 }
 0x14e   : > { %v849_v37 = vadd.f32 %v848_v33, %v800_v32  ;;  %v754_v48 = vadd.f32 %v753_v36, %v705_v40 }
 0x150   : > { %v883_v39 = vmax.f32 %v849_v37, 0.0  ;;  %v884_v58 = vmax.f32 %v754_v48, 0.0 }
 0x152   : > { %v901_v41 = vpack.c.bf16 %v883_v39, %v881_v38 }
 0x153   : > { %v802_v42 = vpop.f32.mrf.mxu2  ;;  %v706_v44 = vpop.f32.mrf.mxu0 }
 0x154   : > { %v851_v43 = vpop.f32.mrf.mxu3  ;;  %1189 = vmatmul.bf16.gmra.mxu1 %v901_v41  ;;  %1287 = vmatmul.bf16.gmra.mxu3 %v901_v41  ;;  %v707_v49 = vadd.f32 %v706_v44, %v3029_v50  ;;  %v755_v53 = vpop.f32.mrf.mxu1  ;;  %v803_v57 = vadd.f32 %v802_v42, %v3032_v54 }
 0x156   : > { %v756_v56 = vadd.f32 %v755_v53, %v707_v49  ;;  %v852_v0 = vadd.f32 %v851_v43, %v803_v57 }
 0x158   : > { %v886_v59 = vmax.f32 %v756_v56, 0.0  ;;  %v885_v7 = vmax.f32 %v852_v0, 0.0 }
 0x15a   : > { %v902_v61 = vpack.c.bf16 %v886_v59, %v884_v58 }
 0x15b   : > { %v804_v60 = vpop.f32.mrf.mxu2 }
 0x15c   : > { %v805_v1 = vadd.f32 %v804_v60, %v3032_v54  ;;  %v853_v50 = vpop.f32.mrf.mxu3  ;;  %1145 = vmatmul.bf16.gmra.mxu0 %v902_v61  ;;  %1243 = vmatmul.bf16.gmra.mxu2 %v902_v61  ;;  %v936_v54 = vld [vmem:[%s3216_s4] sm:$0x3] }
 0x15d   : > { %v3068_v13 = vperm.slane %v936_v54, 0  ;;  %v3071_v18 = vperm.slane %v936_v54, 1 }
 0x15e   : > { %v854_v3 = vadd.f32 %v853_v50, %v805_v1 }
 0x160   : > { %v887_v8 = vmax.f32 %v854_v3, 0.0 }
 0x162   : > { %v903_v9 = vpack.c.bf16 %v887_v8, %v885_v7 }
 0x164   : > { %1194 = vmatmul.bf16.gmra.mxu1 %v903_v9  ;;  %1292 = vmatmul.bf16.gmra.mxu3 %v903_v9 }
 0x169   : > { %v1111_v10 = vpop.f32.mrf.mxu0 }
 0x16a   : > { %v1112_v15 = vadd.f32 %v1111_v10, %v3068_v13 }
 0x16f   : > { %v1209_v11 = vpop.f32.mrf.mxu2 }
 0x170   : > { %v1210_v25 = vadd.f32 %v1209_v11, %v3071_v18 }
 0x171   : > { %v1160_v12 = vpop.f32.mrf.mxu1  ;;  %v1113_v14 = vpop.f32.mrf.mxu0 }
 0x172   : > { %v1161_v17 = vadd.f32 %v1160_v12, %v1112_v15  ;;  %v1114_v19 = vadd.f32 %v1113_v14, %v3068_v13 }
 0x174   : > { %v1298_v24 = vmax.f32 %v1161_v17, 0.0 }
 0x177   : > { %v1258_v16 = vpop.f32.mrf.mxu3  ;;  %v1211_v20 = vpop.f32.mrf.mxu2 }
 0x178   : > { %v1259_v27 = vadd.f32 %v1258_v16, %v1210_v25  ;;  %v1212_v29 = vadd.f32 %v1211_v20, %v3071_v18 }
 0x179   : > { %v1162_v21 = vpop.f32.mrf.mxu1  ;;  %v1116_v23 = vpop.f32.mrf.mxu0 }
 0x17a   : > { %v1163_v22 = vadd.f32 %v1162_v21, %v1114_v19  ;;  %v1299_v34 = vmax.f32 %v1259_v27, 0.0  ;;  %v1117_v38 = vadd.f32 %v1116_v23, %v3068_v13 }
 0x17c   : > { %v1300_v26 = vmax.f32 %v1163_v22, 0.0 }
 0x17e   : > { %v1330_v28 = vpack.c.bf16 %v1300_v26, %v1298_v24 }
 0x17f   : > { %v1260_v30 = vpop.f32.mrf.mxu3  ;;  %v1214_v32 = vpop.f32.mrf.mxu2 }
 0x180   : > { %v1261_v31 = vadd.f32 %v1260_v30, %v1212_v29  ;;  %1552 = vmatmul.bf16.vlgmr.msra.gmra.mxu0 %v1330_v28  ;;  %1650 = vmatmul.bf16.vlgmr.msra.gmra.mxu2 %v1330_v28  ;;  %v1215_v47 = vadd.f32 %v1214_v32, %v3071_v18 }
 0x181   : > { %v1165_v33 = vpop.f32.mrf.mxu1  ;;  %v1118_v36 = vpop.f32.mrf.mxu0 }
 0x182   : > { %v1301_v35 = vmax.f32 %v1261_v31, 0.0  ;;  %v1166_v40 = vadd.f32 %v1165_v33, %v1117_v38  ;;  %v1119_v41 = vadd.f32 %v1118_v36, %v3068_v13 }
 0x184   : > { %v1331_v37 = vpack.c.bf16 %v1301_v35, %v1299_v34  ;;  %v1302_v46 = vmax.f32 %v1166_v40, 0.0 }
 0x186   : > { %1601 = vmatmul.bf16.vlgmr.msra.gmra.mxu1 %v1331_v37  ;;  %1699 = vmatmul.bf16.vlgmr.msra.gmra.mxu3 %v1331_v37 }
 0x187   : > { %v1263_v39 = vpop.f32.mrf.mxu3  ;;  %v1216_v42 = vpop.f32.mrf.mxu2 }
 0x188   : > { %v1264_v49 = vadd.f32 %v1263_v39, %v1215_v47  ;;  %v1217_v51 = vadd.f32 %v1216_v42, %v3071_v18 }
 0x189   : > { %v1167_v43 = vpop.f32.mrf.mxu1  ;;  %v1121_v45 = vpop.f32.mrf.mxu0 }
 0x18a   : > { %v1168_v44 = vadd.f32 %v1167_v43, %v1119_v41  ;;  %v1303_v58 = vmax.f32 %v1264_v49, 0.0  ;;  %v1122_v62 = vadd.f32 %v1121_v45, %v3068_v13 }
 0x18c   : > { %v1304_v48 = vmax.f32 %v1168_v44, 0.0 }
 0x18e   : > { %v1332_v52 = vpack.c.bf16 %v1304_v48, %v1302_v46 }
 0x18f   : > { %v1265_v53 = vpop.f32.mrf.mxu3  ;;  %v1219_v56 = vpop.f32.mrf.mxu2 }
 0x190   : > { %v1266_v55 = vadd.f32 %v1265_v53, %v1217_v51  ;;  %1557 = vmatmul.bf16.gmra.mxu0 %v1332_v52  ;;  %1655 = vmatmul.bf16.gmra.mxu2 %v1332_v52  ;;  %v1220_v6 = vadd.f32 %v1219_v56, %v3071_v18 }
 0x191   : > { %v1170_v57 = vpop.f32.mrf.mxu1  ;;  %v1123_v60 = vpop.f32.mrf.mxu0 }
 0x192   : > { %v1305_v59 = vmax.f32 %v1266_v55, 0.0  ;;  %v1171_v0 = vadd.f32 %v1170_v57, %v1122_v62  ;;  %v1124_v1 = vadd.f32 %v1123_v60, %v3068_v13 }
 0x194   : > { %v1333_v61 = vpack.c.bf16 %v1305_v59, %v1303_v58  ;;  %v1306_v5 = vmax.f32 %v1171_v0, 0.0 }
 0x196   : > { %1606 = vmatmul.bf16.gmra.mxu1 %v1333_v61  ;;  %1704 = vmatmul.bf16.gmra.mxu3 %v1333_v61 }
 0x197   : > { %v1268_v63 = vpop.f32.mrf.mxu3  ;;  %v1221_v2 = vpop.f32.mrf.mxu2 }
 0x198   : > { %v1269_v8 = vadd.f32 %v1268_v63, %v1220_v6  ;;  %v1222_v9 = vadd.f32 %v1221_v2, %v3071_v18 }
 0x199   : > { %v1172_v50 = vpop.f32.mrf.mxu1  ;;  %v1126_v4 = vpop.f32.mrf.mxu0 }
 0x19a   : > { %v1173_v3 = vadd.f32 %v1172_v50, %v1124_v1  ;;  %v1307_v15 = vmax.f32 %v1269_v8, 0.0  ;;  %v1127_v20 = vadd.f32 %v1126_v4, %v3068_v13 }
 0x19c   : > { %v1308_v7 = vmax.f32 %v1173_v3, 0.0 }
 0x19e   : > { %v1334_v10 = vpack.c.bf16 %v1308_v7, %v1306_v5 }
 0x19f   : > { %v1270_v54 = vpop.f32.mrf.mxu3  ;;  %v1224_v12 = vpop.f32.mrf.mxu2 }
 0x1a0   : > { %v1271_v11 = vadd.f32 %v1270_v54, %v1222_v9  ;;  %1562 = vmatmul.bf16.gmra.mxu0 %v1334_v10  ;;  %1660 = vmatmul.bf16.gmra.mxu2 %v1334_v10  ;;  %v1225_v29 = vadd.f32 %v1224_v12, %v3071_v18 }
 0x1a1   : > { %v1175_v14 = vpop.f32.mrf.mxu1  ;;  %v1128_v17 = vpop.f32.mrf.mxu0 }
 0x1a2   : > { %v1309_v16 = vmax.f32 %v1271_v11, 0.0  ;;  %v1176_v22 = vadd.f32 %v1175_v14, %v1127_v20  ;;  %v1129_v23 = vadd.f32 %v1128_v17, %v3068_v13 }
 0x1a4   : > { %v1335_v19 = vpack.c.bf16 %v1309_v16, %v1307_v15  ;;  %v1310_v28 = vmax.f32 %v1176_v22, 0.0 }
 0x1a6   : > { %1611 = vmatmul.bf16.gmra.mxu1 %v1335_v19  ;;  %1709 = vmatmul.bf16.gmra.mxu3 %v1335_v19 }
 0x1a7   : > { %v1273_v21 = vpop.f32.mrf.mxu3  ;;  %v1226_v24 = vpop.f32.mrf.mxu2 }
 0x1a8   : > { %v1274_v31 = vadd.f32 %v1273_v21, %v1225_v29  ;;  %v1227_v32 = vadd.f32 %v1226_v24, %v3071_v18 }
 0x1a9   : > { %v1177_v25 = vpop.f32.mrf.mxu1  ;;  %v1131_v27 = vpop.f32.mrf.mxu0 }
 0x1aa   : > { %v1178_v26 = vadd.f32 %v1177_v25, %v1129_v23  ;;  %v1311_v38 = vmax.f32 %v1274_v31, 0.0  ;;  %v1132_v42 = vadd.f32 %v1131_v27, %v3068_v13 }
 0x1ac   : > { %v1312_v30 = vmax.f32 %v1178_v26, 0.0 }
 0x1ae   : > { %v1336_v33 = vpack.c.bf16 %v1312_v30, %v1310_v28 }
 0x1af   : > { %v1275_v34 = vpop.f32.mrf.mxu3  ;;  %v1229_v36 = vpop.f32.mrf.mxu2 }
 0x1b0   : > { %v1276_v35 = vadd.f32 %v1275_v34, %v1227_v32  ;;  %1567 = vmatmul.bf16.gmra.mxu0 %v1336_v33  ;;  %1665 = vmatmul.bf16.gmra.mxu2 %v1336_v33  ;;  %v1230_v52 = vadd.f32 %v1229_v36, %v3071_v18 }
 0x1b1   : > { %v1180_v37 = vpop.f32.mrf.mxu1  ;;  %v1133_v40 = vpop.f32.mrf.mxu0 }
 0x1b2   : > { %v1313_v39 = vmax.f32 %v1276_v35, 0.0  ;;  %v1181_v44 = vadd.f32 %v1180_v37, %v1132_v42  ;;  %v1134_v45 = vadd.f32 %v1133_v40, %v3068_v13 }
 0x1b4   : > { %v1337_v41 = vpack.c.bf16 %v1313_v39, %v1311_v38  ;;  %v1314_v51 = vmax.f32 %v1181_v44, 0.0 }
 0x1b6   : > { %1616 = vmatmul.bf16.gmra.mxu1 %v1337_v41  ;;  %1714 = vmatmul.bf16.gmra.mxu3 %v1337_v41 }
 0x1b7   : > { %v1278_v43 = vpop.f32.mrf.mxu3  ;;  %v1231_v46 = vpop.f32.mrf.mxu2 }
 0x1b8   : > { %v1279_v55 = vadd.f32 %v1278_v43, %v1230_v52  ;;  %v1232_v57 = vadd.f32 %v1231_v46, %v3071_v18 }
 0x1b9   : > { %v1182_v47 = vpop.f32.mrf.mxu1  ;;  %v1136_v49 = vpop.f32.mrf.mxu0 }
 0x1ba   : > { %v1183_v48 = vadd.f32 %v1182_v47, %v1134_v45  ;;  %v1315_v62 = vmax.f32 %v1279_v55, 0.0  ;;  %v1137_v2 = vadd.f32 %v1136_v49, %v3068_v13 }
 0x1bc   : > { %v1316_v53 = vmax.f32 %v1183_v48, 0.0 }
 0x1be   : > { %v1338_v56 = vpack.c.bf16 %v1316_v53, %v1314_v51 }
 0x1bf   : > { %v1280_v58 = vpop.f32.mrf.mxu3  ;;  %v1234_v60 = vpop.f32.mrf.mxu2 }
 0x1c0   : > { %v1281_v59 = vadd.f32 %v1280_v58, %v1232_v57  ;;  %1572 = vmatmul.bf16.gmra.mxu0 %v1338_v56  ;;  %1670 = vmatmul.bf16.gmra.mxu2 %v1338_v56  ;;  %v1235_v10 = vadd.f32 %v1234_v60, %v3071_v18 }
 0x1c1   : > { %v1185_v61 = vpop.f32.mrf.mxu1  ;;  %v1138_v0 = vpop.f32.mrf.mxu0 }
 0x1c2   : > { %v1317_v63 = vmax.f32 %v1281_v59, 0.0  ;;  %v1186_v3 = vadd.f32 %v1185_v61, %v1137_v2  ;;  %v1139_v4 = vadd.f32 %v1138_v0, %v3068_v13 }
 0x1c4   : > { %v1339_v1 = vpack.c.bf16 %v1317_v63, %v1315_v62  ;;  %v1318_v9 = vmax.f32 %v1186_v3, 0.0 }
 0x1c6   : > { %1621 = vmatmul.bf16.gmra.mxu1 %v1339_v1  ;;  %1719 = vmatmul.bf16.gmra.mxu3 %v1339_v1 }
 0x1c7   : > { %v1283_v50 = vpop.f32.mrf.mxu3  ;;  %v1236_v5 = vpop.f32.mrf.mxu2 }
 0x1c8   : > { %v1284_v11 = vadd.f32 %v1283_v50, %v1235_v10  ;;  %v1237_v14 = vadd.f32 %v1236_v5, %v3071_v18 }
 0x1c9   : > { %v1187_v6 = vpop.f32.mrf.mxu1  ;;  %v1141_v8 = vpop.f32.mrf.mxu0 }
 0x1ca   : > { %v1188_v7 = vadd.f32 %v1187_v6, %v1139_v4  ;;  %v1319_v20 = vmax.f32 %v1284_v11, 0.0  ;;  %v1142_v24 = vadd.f32 %v1141_v8, %v3068_v13 }
 0x1cc   : > { %v1320_v54 = vmax.f32 %v1188_v7, 0.0 }
 0x1ce   : > { %v1340_v12 = vpack.c.bf16 %v1320_v54, %v1318_v9 }
 0x1cf   : > { %v1285_v15 = vpop.f32.mrf.mxu3  ;;  %v1239_v17 = vpop.f32.mrf.mxu2 }
 0x1d0   : > { %v1286_v16 = vadd.f32 %v1285_v15, %v1237_v14  ;;  %1577 = vmatmul.bf16.gmra.mxu0 %v1340_v12  ;;  %1675 = vmatmul.bf16.gmra.mxu2 %v1340_v12  ;;  %v1240_v33 = vadd.f32 %v1239_v17, %v3071_v18 }
 0x1d1   : > { %v1190_v19 = vpop.f32.mrf.mxu1  ;;  %v1143_v22 = vpop.f32.mrf.mxu0 }
 0x1d2   : > { %v1321_v21 = vmax.f32 %v1286_v16, 0.0  ;;  %v1191_v26 = vadd.f32 %v1190_v19, %v1142_v24  ;;  %v1144_v27 = vadd.f32 %v1143_v22, %v3068_v13 }
 0x1d4   : > { %v1341_v23 = vpack.c.bf16 %v1321_v21, %v1319_v20  ;;  %v1322_v32 = vmax.f32 %v1191_v26, 0.0 }
 0x1d6   : > { %1626 = vmatmul.bf16.gmra.mxu1 %v1341_v23  ;;  %1724 = vmatmul.bf16.gmra.mxu3 %v1341_v23 }
 0x1d7   : > { %v1288_v25 = vpop.f32.mrf.mxu3  ;;  %v1241_v28 = vpop.f32.mrf.mxu2 }
 0x1d8   : > { %v1289_v35 = vadd.f32 %v1288_v25, %v1240_v33  ;;  %v1242_v37 = vadd.f32 %v1241_v28, %v3071_v18 }
 0x1d9   : > { %v1192_v29 = vpop.f32.mrf.mxu1  ;;  %v1146_v31 = vpop.f32.mrf.mxu0 }
 0x1da   : > { %v1193_v30 = vadd.f32 %v1192_v29, %v1144_v27  ;;  %v1323_v42 = vmax.f32 %v1289_v35, 0.0  ;;  %v1147_v46 = vadd.f32 %v1146_v31, %v3068_v13 }
 0x1dc   : > { %v1324_v34 = vmax.f32 %v1193_v30, 0.0 }
 0x1de   : > { %v1342_v36 = vpack.c.bf16 %v1324_v34, %v1322_v32 }
 0x1df   : > { %v1290_v38 = vpop.f32.mrf.mxu3  ;;  %v1244_v41 = vpop.f32.mrf.mxu2 }
 0x1e0   : > { %v1291_v39 = vadd.f32 %v1290_v38, %v1242_v37  ;;  %1582 = vmatmul.bf16.gmra.mxu0 %v1342_v36  ;;  %1680 = vmatmul.bf16.gmra.mxu2 %v1342_v36  ;;  %v1245_v56 = vadd.f32 %v1244_v41, %v3071_v18 }
 0x1e1   : > { %v1195_v40 = vpop.f32.mrf.mxu1  ;;  %v1148_v45 = vpop.f32.mrf.mxu0 }
 0x1e2   : > { %v1325_v43 = vmax.f32 %v1291_v39, 0.0  ;;  %v1196_v48 = vadd.f32 %v1195_v40, %v1147_v46  ;;  %v1149_v49 = vadd.f32 %v1148_v45, %v3068_v13  ;;  %v1378_v13 = vld [vmem:[%s3218_s6] sm:$0x3] }
 0x1e3   : > { %v3107_v50 = vperm.slane %v1378_v13, 0  ;;  %v3111_v6 = vperm.slane %v1378_v13, 1 }
 0x1e4   : > { %v1343_v44 = vpack.c.bf16 %v1325_v43, %v1323_v42  ;;  %v1326_v55 = vmax.f32 %v1196_v48, 0.0 }
 0x1e6   : > { %1631 = vmatmul.bf16.gmra.mxu1 %v1343_v44  ;;  %1729 = vmatmul.bf16.gmra.mxu3 %v1343_v44 }
 0x1e7   : > { %v1293_v47 = vpop.f32.mrf.mxu3  ;;  %v1246_v53 = vpop.f32.mrf.mxu2 }
 0x1e8   : > { %v1294_v58 = vadd.f32 %v1293_v47, %v1245_v56  ;;  %v1247_v60 = vadd.f32 %v1246_v53, %v3071_v18 }
 0x1e9   : > { %v1197_v51 = vpop.f32.mrf.mxu1 }
 0x1ea   : > { %v1198_v52 = vadd.f32 %v1197_v51, %v1149_v49  ;;  %v1327_v63 = vmax.f32 %v1294_v58, 0.0 }
 0x1ec   : > { %v1328_v57 = vmax.f32 %v1198_v52, 0.0 }
 0x1ee   : > { %v1344_v59 = vpack.c.bf16 %v1328_v57, %v1326_v55 }
 0x1ef   : > { %v1295_v61 = vpop.f32.mrf.mxu3 }
 0x1f0   : > { %v1296_v62 = vadd.f32 %v1295_v61, %v1247_v60  ;;  %1587 = vmatmul.bf16.gmra.mxu0 %v1344_v59  ;;  %1685 = vmatmul.bf16.gmra.mxu2 %v1344_v59 }
 0x1f2   : > { %v1329_v0 = vmax.f32 %v1296_v62, 0.0 }
 0x1f4   : > { %v1345_v1 = vpack.c.bf16 %v1329_v0, %v1327_v63 }
 0x1f6   : > { %1636 = vmatmul.bf16.gmra.mxu1 %v1345_v1  ;;  %1734 = vmatmul.bf16.gmra.mxu3 %v1345_v1 }
 0x1fd   : > { %v1553_v2 = vpop.f32.mrf.mxu0 }
 0x1fe   : > { %v1554_v3 = vadd.f32 %v1553_v2, %v3107_v50 }
 0x203   : > { %v1602_v18 = vpop.f32.mrf.mxu1  ;;  %v1651_v4 = vpop.f32.mrf.mxu2 }
 0x204   : > { %v1603_v5 = vadd.f32 %v1602_v18, %v1554_v3  ;;  %v1652_v8 = vadd.f32 %v1651_v4, %v3111_v6 }
 0x205   : > { %v1555_v7 = vpop.f32.mrf.mxu0 }
 0x206   : > { %1740 = vst [vmem:[%s3113_s22] sm:$0xff] %v1603_v5  ;;  %v1556_v10 = vadd.f32 %v1555_v7, %v3107_v50 }
 0x209   : > { %v1700_v9 = vpop.f32.mrf.mxu3 }
 0x20a   : > { %v1701_v54 = vadd.f32 %v1700_v9, %v1652_v8 }
 0x20b   : > { %v1604_v11 = vpop.f32.mrf.mxu1  ;;  %v1653_v12 = vpop.f32.mrf.mxu2 }
 0x20c   : > { %1741 = vst [vmem:[%s3113_s22 + $0x8] sm:$0xff] %v1701_v54  ;;  %v1605_v14 = vadd.f32 %v1604_v11, %v1556_v10  ;;  %v1654_v16 = vadd.f32 %v1653_v12, %v3111_v6 }
 0x20d   : > { %v1558_v15 = vpop.f32.mrf.mxu0 }
 0x20e   : > { %1742 = vst [vmem:[%s3113_s22 + $0x10] sm:$0xff] %v1605_v14  ;;  %v1559_v19 = vadd.f32 %v1558_v15, %v3107_v50 }
 0x211   : > { %v1702_v17 = vpop.f32.mrf.mxu3 }
 0x212   : > { %v1703_v20 = vadd.f32 %v1702_v17, %v1654_v16 }
 0x213   : > { %v1607_v21 = vpop.f32.mrf.mxu1  ;;  %v1656_v22 = vpop.f32.mrf.mxu2 }
 0x214   : > { %1743 = vst [vmem:[%s3113_s22 + $0x18] sm:$0xff] %v1703_v20  ;;  %v1608_v23 = vadd.f32 %v1607_v21, %v1559_v19  ;;  %v1657_v25 = vadd.f32 %v1656_v22, %v3111_v6 }
 0x215   : > { %v1560_v24 = vpop.f32.mrf.mxu0 }
 0x216   : > { %1744 = vst [vmem:[%s3113_s22 + $0x20] sm:$0xff] %v1608_v23  ;;  %v1561_v27 = vadd.f32 %v1560_v24, %v3107_v50 }
 0x219   : > { %v1705_v26 = vpop.f32.mrf.mxu3 }
 0x21a   : > { %v1706_v28 = vadd.f32 %v1705_v26, %v1657_v25 }
 0x21b   : > { %v1609_v29 = vpop.f32.mrf.mxu1  ;;  %v1658_v30 = vpop.f32.mrf.mxu2 }
 0x21c   : > { %1745 = vst [vmem:[%s3113_s22 + $0x28] sm:$0xff] %v1706_v28  ;;  %v1610_v31 = vadd.f32 %v1609_v29, %v1561_v27  ;;  %v1659_v33 = vadd.f32 %v1658_v30, %v3111_v6 }
 0x21d   : > { %v1563_v32 = vpop.f32.mrf.mxu0 }
 0x21e   : > { %1746 = vst [vmem:[%s3113_s22 + $0x30] sm:$0xff] %v1610_v31  ;;  %v1564_v35 = vadd.f32 %v1563_v32, %v3107_v50 }
 0x221   : > { %v1707_v34 = vpop.f32.mrf.mxu3 }
 0x222   : > { %v1708_v36 = vadd.f32 %v1707_v34, %v1659_v33 }
 0x223   : > { %v1612_v37 = vpop.f32.mrf.mxu1  ;;  %v1661_v38 = vpop.f32.mrf.mxu2 }
 0x224   : > { %1747 = vst [vmem:[%s3113_s22 + $0x38] sm:$0xff] %v1708_v36  ;;  %v1613_v39 = vadd.f32 %v1612_v37, %v1564_v35  ;;  %v1662_v41 = vadd.f32 %v1661_v38, %v3111_v6 }
 0x225   : > { %v1565_v40 = vpop.f32.mrf.mxu0 }
 0x226   : > { %1748 = vst [vmem:[%s3113_s22 + $0x40] sm:$0xff] %v1613_v39  ;;  %v1566_v43 = vadd.f32 %v1565_v40, %v3107_v50 }
 0x229   : > { %v1710_v42 = vpop.f32.mrf.mxu3 }
 0x22a   : > { %v1711_v44 = vadd.f32 %v1710_v42, %v1662_v41 }
 0x22b   : > { %v1614_v45 = vpop.f32.mrf.mxu1  ;;  %v1663_v46 = vpop.f32.mrf.mxu2 }
 0x22c   : > { %1749 = vst [vmem:[%s3113_s22 + $0x48] sm:$0xff] %v1711_v44  ;;  %v1615_v47 = vadd.f32 %v1614_v45, %v1566_v43  ;;  %v1664_v49 = vadd.f32 %v1663_v46, %v3111_v6 }
 0x22d   : > { %v1568_v48 = vpop.f32.mrf.mxu0 }
 0x22e   : > { %1750 = vst [vmem:[%s3113_s22 + $0x50] sm:$0xff] %v1615_v47  ;;  %v1569_v52 = vadd.f32 %v1568_v48, %v3107_v50 }
 0x231   : > { %v1712_v51 = vpop.f32.mrf.mxu3 }
 0x232   : > { %v1713_v53 = vadd.f32 %v1712_v51, %v1664_v49 }
 0x233   : > { %v1617_v55 = vpop.f32.mrf.mxu1  ;;  %v1666_v56 = vpop.f32.mrf.mxu2 }
 0x234   : > { %1751 = vst [vmem:[%s3113_s22 + $0x58] sm:$0xff] %v1713_v53  ;;  %v1618_v57 = vadd.f32 %v1617_v55, %v1569_v52  ;;  %v1667_v59 = vadd.f32 %v1666_v56, %v3111_v6 }
 0x235   : > { %v1570_v58 = vpop.f32.mrf.mxu0 }
 0x236   : > { %1752 = vst [vmem:[%s3113_s22 + $0x60] sm:$0xff] %v1618_v57  ;;  %v1571_v61 = vadd.f32 %v1570_v58, %v3107_v50 }
 0x239   : > { %v1715_v60 = vpop.f32.mrf.mxu3 }
 0x23a   : > { %v1716_v62 = vadd.f32 %v1715_v60, %v1667_v59 }
 0x23b   : > { %v1619_v63 = vpop.f32.mrf.mxu1  ;;  %v1668_v0 = vpop.f32.mrf.mxu2 }
 0x23c   : > { %1753 = vst [vmem:[%s3113_s22 + $0x68] sm:$0xff] %v1716_v62  ;;  %v1620_v1 = vadd.f32 %v1619_v63, %v1571_v61  ;;  %v1669_v2 = vadd.f32 %v1668_v0, %v3111_v6 }
 0x23d   : > { %v1573_v13 = vpop.f32.mrf.mxu0 }
 0x23e   : > { %1754 = vst [vmem:[%s3113_s22 + $0x70] sm:$0xff] %v1620_v1  ;;  %v1574_v18 = vadd.f32 %v1573_v13, %v3107_v50 }
 0x241   : > { %v1717_v3 = vpop.f32.mrf.mxu3 }
 0x242   : > { %v1718_v4 = vadd.f32 %v1717_v3, %v1669_v2 }
 0x243   : > { %v1622_v5 = vpop.f32.mrf.mxu1  ;;  %v1671_v7 = vpop.f32.mrf.mxu2 }
 0x244   : > { %1755 = vst [vmem:[%s3113_s22 + $0x78] sm:$0xff] %v1718_v4  ;;  %v1623_v8 = vadd.f32 %v1622_v5, %v1574_v18  ;;  %v1672_v10 = vadd.f32 %v1671_v7, %v3111_v6 }
 0x245   : > { %v1575_v9 = vpop.f32.mrf.mxu0 }
 0x246   : > { %1756 = vst [vmem:[%s3113_s22 + $0x80] sm:$0xff] %v1623_v8  ;;  %v1576_v11 = vadd.f32 %v1575_v9, %v3107_v50 }
 0x249   : > { %v1720_v54 = vpop.f32.mrf.mxu3 }
 0x24a   : > { %v1721_v12 = vadd.f32 %v1720_v54, %v1672_v10 }
 0x24b   : > { %v1624_v14 = vpop.f32.mrf.mxu1  ;;  %v1673_v15 = vpop.f32.mrf.mxu2 }
 0x24c   : > { %1757 = vst [vmem:[%s3113_s22 + $0x88] sm:$0xff] %v1721_v12  ;;  %v1625_v16 = vadd.f32 %v1624_v14, %v1576_v11  ;;  %v1674_v19 = vadd.f32 %v1673_v15, %v3111_v6 }
 0x24d   : > { %v1578_v17 = vpop.f32.mrf.mxu0 }
 0x24e   : > { %1758 = vst [vmem:[%s3113_s22 + $0x90] sm:$0xff] %v1625_v16  ;;  %v1579_v21 = vadd.f32 %v1578_v17, %v3107_v50 }
 0x251   : > { %v1722_v20 = vpop.f32.mrf.mxu3 }
 0x252   : > { %v1723_v22 = vadd.f32 %v1722_v20, %v1674_v19 }
 0x253   : > { %v1627_v23 = vpop.f32.mrf.mxu1  ;;  %v1676_v24 = vpop.f32.mrf.mxu2 }
 0x254   : > { %1759 = vst [vmem:[%s3113_s22 + $0x98] sm:$0xff] %v1723_v22  ;;  %v1628_v25 = vadd.f32 %v1627_v23, %v1579_v21  ;;  %v1677_v27 = vadd.f32 %v1676_v24, %v3111_v6 }
 0x255   : > { %v1580_v26 = vpop.f32.mrf.mxu0 }
 0x256   : > { %1760 = vst [vmem:[%s3113_s22 + $0xa0] sm:$0xff] %v1628_v25  ;;  %v1581_v29 = vadd.f32 %v1580_v26, %v3107_v50 }
 0x259   : > { %v1725_v28 = vpop.f32.mrf.mxu3 }
 0x25a   : > { %v1726_v30 = vadd.f32 %v1725_v28, %v1677_v27 }
 0x25b   : > { %v1629_v31 = vpop.f32.mrf.mxu1  ;;  %v1678_v32 = vpop.f32.mrf.mxu2 }
 0x25c   : > { %1761 = vst [vmem:[%s3113_s22 + $0xa8] sm:$0xff] %v1726_v30  ;;  %v1630_v33 = vadd.f32 %v1629_v31, %v1581_v29  ;;  %v1679_v35 = vadd.f32 %v1678_v32, %v3111_v6 }
 0x25d   : > { %v1583_v34 = vpop.f32.mrf.mxu0 }
 0x25e   : > { %1762 = vst [vmem:[%s3113_s22 + $0xb0] sm:$0xff] %v1630_v33  ;;  %v1584_v37 = vadd.f32 %v1583_v34, %v3107_v50 }
 0x261   : > { %v1727_v36 = vpop.f32.mrf.mxu3 }
 0x262   : > { %v1728_v38 = vadd.f32 %v1727_v36, %v1679_v35 }
 0x263   : > { %v1632_v39 = vpop.f32.mrf.mxu1  ;;  %v1681_v40 = vpop.f32.mrf.mxu2 }
 0x264   : > { %1763 = vst [vmem:[%s3113_s22 + $0xb8] sm:$0xff] %v1728_v38  ;;  %v1633_v41 = vadd.f32 %v1632_v39, %v1584_v37  ;;  %v1682_v43 = vadd.f32 %v1681_v40, %v3111_v6 }
 0x265   : > { %v1585_v42 = vpop.f32.mrf.mxu0 }
 0x266   : > { %1764 = vst [vmem:[%s3113_s22 + $0xc0] sm:$0xff] %v1633_v41  ;;  %v1586_v45 = vadd.f32 %v1585_v42, %v3107_v50 }
 0x269   : > { %v1730_v44 = vpop.f32.mrf.mxu3 }
 0x26a   : > { %v1731_v46 = vadd.f32 %v1730_v44, %v1682_v43 }
 0x26b   : > { %v1634_v47 = vpop.f32.mrf.mxu1  ;;  %v1683_v48 = vpop.f32.mrf.mxu2 }
 0x26c   : > { %1765 = vst [vmem:[%s3113_s22 + $0xc8] sm:$0xff] %v1731_v46  ;;  %v1635_v49 = vadd.f32 %v1634_v47, %v1586_v45  ;;  %v1684_v52 = vadd.f32 %v1683_v48, %v3111_v6 }
 0x26d   : > { %v1588_v51 = vpop.f32.mrf.mxu0 }
 0x26e   : > { %1766 = vst [vmem:[%s3113_s22 + $0xd0] sm:$0xff] %v1635_v49  ;;  %v1589_v55 = vadd.f32 %v1588_v51, %v3107_v50 }
 0x271   : > { %v1732_v53 = vpop.f32.mrf.mxu3 }
 0x272   : > { %v1733_v56 = vadd.f32 %v1732_v53, %v1684_v52 }
 0x273   : > { %v1637_v57 = vpop.f32.mrf.mxu1  ;;  %v1686_v58 = vpop.f32.mrf.mxu2 }
 0x274   : > { %1767 = vst [vmem:[%s3113_s22 + $0xd8] sm:$0xff] %v1733_v56  ;;  %v1638_v59 = vadd.f32 %v1637_v57, %v1589_v55  ;;  %v1687_v61 = vadd.f32 %v1686_v58, %v3111_v6 }
 0x275   : > { %v1590_v60 = vpop.f32.mrf.mxu0 }
 0x276   : > { %1768 = vst [vmem:[%s3113_s22 + $0xe0] sm:$0xff] %v1638_v59  ;;  %v1591_v63 = vadd.f32 %v1590_v60, %v3107_v50 }
 0x279   : > { %v1735_v62 = vpop.f32.mrf.mxu3 }
 0x27a   : > { %v1736_v0 = vadd.f32 %v1735_v62, %v1687_v61 }
 0x27b   : > { %v1639_v1 = vpop.f32.mrf.mxu1  ;;  %v1688_v2 = vpop.f32.mrf.mxu2 }
 0x27c   : > { %1769 = vst [vmem:[%s3113_s22 + $0xe8] sm:$0xff] %v1736_v0  ;;  %v1640_v13 = vadd.f32 %v1639_v1, %v1591_v63  ;;  %v1689_v3 = vadd.f32 %v1688_v2, %v3111_v6 }
 0x27e   : > { %1770 = vst [vmem:[%s3113_s22 + $0xf0] sm:$0xff] %v1640_v13 }
 0x281   : > { %v1737_v18 = vpop.f32.mrf.mxu3 }
 0x282   : > { %v1738_v50 = vadd.f32 %v1737_v18, %v1689_v3 }
 0x284   : > { %1771 = vst [vmem:[%s3113_s22 + $0xf8] sm:$0xff] %v1738_v50 }
 0x285   : > { %2756 = shalt.err (!%p2753_p10)
}
 0x286   : > { %s2811_s11 = smov 256   ;;  %s2812_s22 = smov 16  }
 0x287   : > { %2506 = dma.vmem_to_hbm [thread:$0]  (%p2946_p3), %s1787_s17, 4096, %s1789_s20, %s1773_s28, %s2811_s11, %s2811_s11, %s2812_s22  }
 0x288 PF: > { %s1803_s13 = sand.u32 1, %s2791_s24   ;;  %p3232_p12 = scmp.ge.s32.totalorder %s2803_s27, 2 }
 0x289   : > { %s1804_s14 = scalar_lea.sflag [#allocation4], %s1803_s13 }
 0x28a   : > { %p2526_p13 = pnand %p3232_p12, %p2888_p6 }
 0x28c   : > { %p2527_p0 = pneg %p2526_p13 }
 0x28e   : > { %2786 = dma.done.wait (%p2527_p0), %s1804_s14, 4096  }
 0x28f   : > { %2788 = vsyncadd (%p2527_p0), %s1804_s14, 4294963200  ;;  %p22_p5 = scmp.ge.s32.totalorder %s2936_s18, 4   ;;  %s3233_s24 = smov %s2795_s25 }
 0x290   : > { %s3234_s25 = smov %s2799_s26  ;;  %s3235_s26 = smov %s2952_s9 }
 0x291   : > { %s3236_s27 = smov %s2936_s18  ;;  %24 = sbr.rel (!%p22_p5) target bundleno = 9 (0x9), region = 109 }
 0x296   :  { %1810 = vsyncpa [#allocation3], 1 }
 0x297   :  { %1812 = vsyncpa [#allocation3 + $0x1], 1 }
 0x298   :  { %1813 = vsyncpa [#allocation6], 1 }
 0x299   :  { %1814 = vsyncpa [#allocation9], 1 }
 0x29a   :  { %1815 = vsyncpa [#allocation4], 1 }
 0x29b   :  { %1817 = vsyncpa [#allocation4 + $0x1], 1 }

</bundles_post_ra>
